<compile_context>
chip_gen: v7x
topology: tpu7x:2x2x1
jax: 0.10.0
libtpu: 0.0.40
codegen_flags: <defaults>
</compile_context>

<pallas_src>
import numpy as np
import jax
import jax.numpy as jnp
from jax import lax
from jax.experimental import pallas as pl
from jax.experimental.pallas import tpu as pltpu


def _bilinear_matrix(in_size, out_size):
    """Interp matrix matching F.interpolate(mode='bilinear', align_corners=False)."""
    M = np.zeros((out_size, in_size), np.float32)
    scale = in_size / out_size
    for o in range(out_size):
        src = max(scale * (o + 0.5) - 0.5, 0.0)
        i0 = min(int(np.floor(src)), in_size - 1)
        i1 = min(i0 + 1, in_size - 1)
        lam = min(max(src - i0, 0.0), 1.0)
        M[o, i0] += 1.0 - lam
        M[o, i1] += lam
    return M


def _num_tensorcores():
    """Best-effort TensorCores-per-device guess (v7x/megacore -> 2, else 1)."""
    try:
        kind = jax.devices()[0].device_kind.lower()
    except Exception:
        return 1
    return 2 if any(t in kind for t in ("v7", "7x", "v4")) else 1


def _samples_per_step(n):
    """Largest per-step batch that still leaves >= num_TC parallel grid steps."""
    tc = _num_tensorcores()
    for b in range(n, 0, -1):
        if n % b == 0 and n // b >= tc:
            return b
    return 1


# ----------------------------------------------------------------------------
# Fused TFAM kernel: one grid step == B batch samples, fully lane-dense.
# ----------------------------------------------------------------------------
def _tfam_kernel(x_ref, w1t_ref, b1_ref, wcat_ref, bca_ref,
                 maskt_ref, rrep_ref, avgrep_ref, wx_ref, cbig_ref, bpos_ref,
                 w2t_ref, b2_ref, o_ref):
    B, _, M = x_ref.shape
    mid = w1t_ref.shape[0]
    NW = maskt_ref.shape[0]
    inv_m = 1.0 / M
    neg_fill = jnp.float32(-1e30)          # finite fill (review correctness note)

    for b in range(B):
        xT = x_ref[b].astype(jnp.float32)                               # (C, M)

        # ---- conv1x1_1 (C -> mid): one MXU matmul, output lane-dense --------
        tT = jnp.dot(w1t_ref[...], xT,
                     preferred_element_type=jnp.float32) + b1_ref[...]  # (mid, M)

        # ---- ChannelUnit: global avg pool + split 1x1 convs (block-diag) ----
        s = jnp.sum(tT, axis=1, keepdims=True) * inv_m                  # (mid, 1)
        gate_ca = jnp.dot(wcat_ref[...], s,
                          preferred_element_type=jnp.float32) + bca_ref[...]
        caT = tT * gate_ca                                              # (mid, M)

        # ---- PositionalUnit ---------------------------------------------------
        # avg pool, already replicated into the folded (tap, window) layout:
        # p2_avg[c, kap] = avgpool[window(kap), c]  -- ONE matmul, no loops.
        p2_avg = jnp.dot(tT, avgrep_ref[...],
                         preferred_element_type=jnp.float32)            # (mid, K2)

        # max pool: NW (=4) lane-masked reductions on the 2-vreg tT, then
        # replicate into the same (tap, window) layout with rrep rows.
        p2_max = None
        for k in range(NW):
            msk = maskt_ref[k:k + 1, :] > 0.5                           # (1, M)
            mx = jnp.max(jnp.where(msk, tT, neg_fill),
                         axis=1, keepdims=True)                         # (mid, 1)
            term = mx * rrep_ref[k:k + 1, :]                            # (mid, K2)
            p2_max = term if p2_max is None else p2_max + term

        # column-wise contraction with the folded 7x7 conv weights:
        # L[d, kap] = sum_cc wpos[tap(kap), cc, d] * pool[window(kap), cc]
        pos_l = None
        for c in range(mid):
            term = wx_ref[c] * p2_max[c:c + 1, :]                       # max channels
            pos_l = term if pos_l is None else pos_l + term
        for c in range(mid):
            pos_l = pos_l + wx_ref[mid + c] * p2_avg[c:c + 1, :]        # avg channels

        # upsample + zero-pad + 7x7 conv, all folded into ONE matmul with cbig.
        posT = jnp.dot(pos_l, cbig_ref[...],
                       preferred_element_type=jnp.float32) + bpos_ref[...]  # (mid, M)

        # ---- merge, conv1x1_2 (mid -> C), sigmoid gate, x * gate ------------
        outT = jnp.dot(w2t_ref[...], caT + posT,
                       preferred_element_type=jnp.float32) + b2_ref[...]    # (C, M)
        o_ref[b] = (xT * jax.nn.sigmoid(outT)).astype(o_ref.dtype)


# ----------------------------------------------------------------------------
# Wrapper: trace-time geometry folding + single pallas_call.
# ----------------------------------------------------------------------------
def tfam_forward(params, x):
    """TwoFoldAttentionModule forward.  x: (N, C, H, W) NCHW, C % 32 == 0, H,W >= 7."""
    N, C, H, W = x.shape
    mid = C // 16
    half = mid // 2
    Cp = 2 * mid
    K = 7
    pad = K // 2
    OH, OW = H // K, W // K
    NW = OH * OW
    M = H * W
    K2 = K * K * NW

    # ---- trace-time geometry constants (numpy) -------------------------------
    Mh = _bilinear_matrix(OH, H)                                     # (H, OH)
    Mw = _bilinear_matrix(OW, W)                                     # (W, OW)
    Mh_pad = np.zeros((H + 2 * pad, OH), np.float32); Mh_pad[pad:pad + H] = Mh
    Mw_pad = np.zeros((W + 2 * pad, OW), np.float32); Mw_pad[pad:pad + W] = Mw

    # cbig[(tap, nw), m] = bilinear weight of pooled window nw at padded
    # position (h+i, w+j)  ==  (zero-pad + upsample + conv-tap shift) folded.
    cbig = np.zeros((K2, M), np.float32)
    for i in range(K):
        for j in range(K):
            for oh in range(OH):
                for ow in range(OW):
                    kap = (i * K + j) * NW + oh * OW + ow
                    cbig[kap] = np.outer(Mh_pad[i:i + H, oh],
                                         Mw_pad[j:j + W, ow]).reshape(M)

    # 7x7 pooling window indicators (VALID pooling: top-left OH*7 x OW*7 only).
    winmask = np.zeros((H, W, OH, OW), np.float32)
    for oh in range(OH):
        for ow in range(OW):
            winmask[oh * K:(oh + 1) * K, ow * K:(ow + 1) * K, oh, ow] = 1.0
    winmask = winmask.reshape(M, NW)
    maskt = np.ascontiguousarray(winmask.T)                          # (NW, M) lane-dense
    nw_of_k = np.arange(K2) % NW
    avgrep = winmask[:, nw_of_k] * (1.0 / (K * K))                   # (M, K2)
    rrep = (nw_of_k[None, :] == np.arange(NW)[:, None]).astype(np.float32)  # (NW, K2)

    # ---- weight prep (tiny, runs in XLA outside the kernel) ------------------
    w1t = params["w1"].T                                             # (mid, C)
    b1c = params["b1"][:, None]
    z = jnp.zeros((half, half), jnp.float32)
    wcat = jnp.concatenate(
        [jnp.concatenate([params["wca1"].T, z], axis=1),
         jnp.concatenate([z, params["wca2"].T], axis=1)], axis=0)    # (mid, mid)
    bcac = jnp.concatenate([params["bca1"], params["bca2"]])[:, None]
    wx = jnp.transpose(params["wpos"].reshape(K * K, Cp, mid), (1, 2, 0))  # (Cp, mid, 49)
    wx = jnp.repeat(wx, NW, axis=2)                                  # (Cp, mid, K2)
    bposc = params["bpos"][:, None]
    w2t = params["w2"].T                                             # (C, mid)
    b2c = params["b2"][:, None]

    B = _samples_per_step(N)     # v5e/v6e: whole batch per step; v7x: >=2 steps
    x3 = x.reshape(N, C, M)

    def cspec(shape):
        nd = len(shape)
        return pl.BlockSpec(shape, lambda n, _nd=nd: (0,) * _nd)

    out = pl.pallas_call(
        _tfam_kernel,
        out_shape=jax.ShapeDtypeStruct((N, C, M), x.dtype),
        grid=(N // B,),
        in_specs=[
            pl.BlockSpec((B, C, M), lambda n: (n, 0, 0)),            # x (per-step block)
            cspec((mid, C)), cspec((mid, 1)),                        # w1^T, b1
            cspec((mid, mid)), cspec((mid, 1)),                      # wca^T (block-diag), bca
            cspec((NW, M)),                                          # window masks (lane-dense)
            cspec((NW, K2)),                                         # window -> (tap, nw) replication
            cspec((M, K2)),                                          # folded avg-pool operator
            cspec((Cp, mid, K2)),                                    # folded 7x7 conv weights
            cspec((K2, M)),                                          # folded upsample+pad+shift
            cspec((mid, 1)),                                         # bpos
            cspec((C, mid)), cspec((C, 1)),                          # w2^T, b2
        ],
        out_specs=pl.BlockSpec((B, C, M), lambda n: (n, 0, 0)),
        compiler_params=pltpu.CompilerParams(
            dimension_semantics=("parallel",)),
    )(x3, w1t, b1c, wcat, bcac,
      jnp.asarray(maskt), jnp.asarray(rrep), jnp.asarray(avgrep),
      wx, jnp.asarray(cbig), bposc, w2t, b2c)
    return out.reshape(N, C, H, W)


# ----------------------------------------------------------------------------
# Plain-JAX reference (same math, independent code path) for validation.
# ----------------------------------------------------------------------------
def tfam_reference(params, x_nchw):
    x = jnp.transpose(x_nchw, (0, 2, 3, 1))                          # NHWC internally
    N, H, W, C = x.shape
    mid = C // 16
    half = mid // 2
    K = 7
    hp = lax.Precision.HIGHEST
    t = jnp.einsum("nhwc,cd->nhwd", x, params["w1"], precision=hp) + params["b1"]
    s = jnp.mean(t, axis=(1, 2), keepdims=True)
    o1 = jnp.einsum("nhwc,cd->nhwd", s[..., :half], params["wca1"], precision=hp) + params["bca1"]
    o2 = jnp.einsum("nhwc,cd->nhwd", s[..., half:], params["wca2"], precision=hp) + params["bca2"]
    ca = jnp.concatenate([o1, o2], axis=-1) * t
    pmax = lax.reduce_window(t, -jnp.inf, lax.max, (1, K, K, 1), (1, K, K, 1), "VALID")
    pavg = lax.reduce_window(t, 0.0, lax.add, (1, K, K, 1), (1, K, K, 1), "VALID") / (K * K)
    pool = jnp.concatenate([pmax, pavg], axis=-1)
    Mh = jnp.asarray(_bilinear_matrix(H // K, H))
    Mw = jnp.asarray(_bilinear_matrix(W // K, W))
    up = jnp.einsum("Hh,Ww,nhwc->nHWc", Mh, Mw, pool, precision=hp)
    pos = lax.conv_general_dilated(
        up, params["wpos"], window_strides=(1, 1),
        padding=((K // 2, K // 2), (K // 2, K // 2)),
        dimension_numbers=("NHWC", "HWIO", "NHWC"), precision=hp) + params["bpos"]
    gate = jax.nn.sigmoid(
        jnp.einsum("nhwc,cd->nhwd", ca + pos, params["w2"], precision=hp) + params["b2"])
    return jnp.transpose(x * gate, (0, 3, 1, 2))


# ----------------------------------------------------------------------------
# Deterministic parameter construction (mirrors nn.Conv2d init bounds).
# ----------------------------------------------------------------------------
def make_tfam_params(key, C):
    mid = C // 16
    half = mid // 2
    Cp = 2 * mid
    ks = jax.random.split(key, 10)

    def u(k, shape, fan_in):
        b = 1.0 / np.sqrt(fan_in)
        return jax.random.uniform(k, shape, jnp.float32, -b, b)

    return {
        "w1":   u(ks[0], (C, mid), C),          "b1":   u(ks[1], (mid,), C),
        "wca1": u(ks[2], (half, half), half),   "bca1": u(ks[3], (half,), half),
        "wca2": u(ks[4], (half, half), half),   "bca2": u(ks[5], (half,), half),
        "wpos": u(ks[6], (7, 7, Cp, mid), 49 * Cp), "bpos": u(ks[7], (mid,), 49 * Cp),
        "w2":   u(ks[8], (mid, C), mid),        "b2":   u(ks[9], (C,), mid),
    }


# ----------------------------------------------------------------------------
if __name__ == "__main__":
    # NCHW input, like the PyTorch module.  C must be a multiple of 32
    # (reduction_factor=16, then the ChannelUnit splits channels by 2).
    N, C, H, W = 2, 64, 16, 16

    key = jax.random.PRNGKey(0)
    kx, kp = jax.random.split(key)
    x = jax.random.normal(kx, (N, C, H, W), jnp.float32)
    params = make_tfam_params(kp, C)

    fwd = jax.jit(tfam_forward)
    y = jax.block_until_ready(fwd(params, x))

    assert y.shape == (N, C, H, W), y.shape
    assert bool(jnp.all(jnp.isfinite(y)))

    y_ref = jax.block_until_ready(jax.jit(tfam_reference)(params, x))
    err = float(jnp.max(jnp.abs(y - y_ref)))
    assert err < 2e-3, f"max abs error vs reference: {err}"

    print("KERNEL_OK")
</pallas_src>

<mosaic_0001>
module attributes {stable_mosaic.version = 11 : i64} {
  func.func @_tfam_kernel(%arg0: i32, %arg1: memref<2x64x256xf32, #tpu.memory_space<vmem>>, %arg2: memref<4x64xf32, #tpu.memory_space<vmem>>, %arg3: memref<4x1xf32, #tpu.memory_space<vmem>>, %arg4: memref<4x4xf32, #tpu.memory_space<vmem>>, %arg5: memref<4x1xf32, #tpu.memory_space<vmem>>, %arg6: memref<4x256xf32, #tpu.memory_space<vmem>>, %arg7: memref<4x196xf32, #tpu.memory_space<vmem>>, %arg8: memref<256x196xf32, #tpu.memory_space<vmem>>, %arg9: memref<8x4x196xf32, #tpu.memory_space<vmem>>, %arg10: memref<196x256xf32, #tpu.memory_space<vmem>>, %arg11: memref<4x1xf32, #tpu.memory_space<vmem>>, %arg12: memref<64x4xf32, #tpu.memory_space<vmem>>, %arg13: memref<64x1xf32, #tpu.memory_space<vmem>>, %arg14: memref<2x64x256xf32, #tpu.memory_space<vmem>>) attributes {dimension_semantics = [#tpu.dimension_semantics<parallel>], iteration_bounds = array<i64: 1>, scalar_prefetch = 0 : i64, scratch_operands = 0 : i64, tpu.core_type = #tpu.core_type<tc>, window_params = [{transform_indices = @transform_0, window_bounds = array<i64: 2, 64, 256>}, {pipeline_mode = #tpu.pipeline_mode<synchronous>, transform_indices = @transform_1, window_bounds = array<i64: 4, 64>}, {pipeline_mode = #tpu.pipeline_mode<synchronous>, transform_indices = @transform_2, window_bounds = array<i64: 4, 1>}, {pipeline_mode = #tpu.pipeline_mode<synchronous>, transform_indices = @transform_3, window_bounds = array<i64: 4, 4>}, {pipeline_mode = #tpu.pipeline_mode<synchronous>, transform_indices = @transform_4, window_bounds = array<i64: 4, 1>}, {pipeline_mode = #tpu.pipeline_mode<synchronous>, transform_indices = @transform_5, window_bounds = array<i64: 4, 256>}, {pipeline_mode = #tpu.pipeline_mode<synchronous>, transform_indices = @transform_6, window_bounds = array<i64: 4, 196>}, {pipeline_mode = #tpu.pipeline_mode<synchronous>, transform_indices = @transform_7, window_bounds = array<i64: 256, 196>}, {pipeline_mode = #tpu.pipeline_mode<synchronous>, transform_indices = @transform_8, window_bounds = array<i64: 8, 4, 196>}, {pipeline_mode = #tpu.pipeline_mode<synchronous>, transform_indices = @transform_9, window_bounds = array<i64: 196, 256>}, {pipeline_mode = #tpu.pipeline_mode<synchronous>, transform_indices = @transform_10, window_bounds = array<i64: 4, 1>}, {pipeline_mode = #tpu.pipeline_mode<synchronous>, transform_indices = @transform_11, window_bounds = array<i64: 64, 4>}, {pipeline_mode = #tpu.pipeline_mode<synchronous>, transform_indices = @transform_12, window_bounds = array<i64: 64, 1>}, {transform_indices = @transform_13, window_bounds = array<i64: 2, 64, 256>}]} {
    %c0 = arith.constant 0 : index
    %c0_0 = arith.constant 0 : index
    %c0_1 = arith.constant 0 : index
    %0 = vector.load %arg1[%c0, %c0_0, %c0_1] : memref<2x64x256xf32, #tpu.memory_space<vmem>>, vector<1x64x256xf32>
    %1 = vector.shape_cast %0 : vector<1x64x256xf32> to vector<64x256xf32>
    %c0_2 = arith.constant 0 : index
    %c0_3 = arith.constant 0 : index
    %2 = vector.load %arg2[%c0_2, %c0_3] : memref<4x64xf32, #tpu.memory_space<vmem>>, vector<4x64xf32>
    %cst = arith.constant dense<0.000000e+00> : vector<4x256xf32>
    %3 = tpu.matmul %2, %1, %cst {dimension_numbers = #tpu.dot_dimension_numbers<[1], [0], [0], [1], [0, 0, 1, 1], [], []>} : vector<4x64xf32>, vector<64x256xf32>, vector<4x256xf32> -> vector<4x256xf32>
    %c0_4 = arith.constant 0 : index
    %c0_5 = arith.constant 0 : index
    %4 = vector.load %arg3[%c0_4, %c0_5] : memref<4x1xf32, #tpu.memory_space<vmem>>, vector<4x1xf32>
    %5 = vector.broadcast %4 : vector<4x1xf32> to vector<4x256xf32>
    %6 = arith.addf %3, %5 : vector<4x256xf32>
    %cst_6 = arith.constant dense<0.000000e+00> : vector<4xf32>
    %7 = vector.multi_reduction <add>, %6, %cst_6 [1] : vector<4x256xf32> to vector<4xf32>
    %8 = vector.shape_cast %7 : vector<4xf32> to vector<4x1xf32>
    %cst_7 = arith.constant 3.906250e-03 : f32
    %9 = vector.broadcast %cst_7 : f32 to vector<4x1xf32>
    %10 = arith.mulf %8, %9 : vector<4x1xf32>
    %c0_8 = arith.constant 0 : index
    %c0_9 = arith.constant 0 : index
    %11 = vector.load %arg4[%c0_8, %c0_9] : memref<4x4xf32, #tpu.memory_space<vmem>>, vector<4x4xf32>
    %cst_10 = arith.constant dense<0.000000e+00> : vector<4x1xf32>
    %12 = tpu.matmul %11, %10, %cst_10 {dimension_numbers = #tpu.dot_dimension_numbers<[1], [0], [0], [1], [0, 0, 1, 1], [], []>} : vector<4x4xf32>, vector<4x1xf32>, vector<4x1xf32> -> vector<4x1xf32>
    %c0_11 = arith.constant 0 : index
    %c0_12 = arith.constant 0 : index
    %13 = vector.load %arg5[%c0_11, %c0_12] : memref<4x1xf32, #tpu.memory_space<vmem>>, vector<4x1xf32>
    %14 = arith.addf %12, %13 : vector<4x1xf32>
    %15 = vector.broadcast %14 : vector<4x1xf32> to vector<4x256xf32>
    %16 = arith.mulf %6, %15 : vector<4x256xf32>
    %c0_13 = arith.constant 0 : index
    %c0_14 = arith.constant 0 : index
    %17 = vector.load %arg8[%c0_13, %c0_14] : memref<256x196xf32, #tpu.memory_space<vmem>>, vector<256x196xf32>
    %cst_15 = arith.constant dense<0.000000e+00> : vector<4x196xf32>
    %18 = tpu.matmul %6, %17, %cst_15 {dimension_numbers = #tpu.dot_dimension_numbers<[1], [0], [0], [1], [0, 0, 1, 1], [], []>} : vector<4x256xf32>, vector<256x196xf32>, vector<4x196xf32> -> vector<4x196xf32>
    %c0_16 = arith.constant 0 : index
    %c0_17 = arith.constant 0 : index
    %19 = vector.load %arg6[%c0_16, %c0_17] : memref<4x256xf32, #tpu.memory_space<vmem>>, vector<1x256xf32>
    %cst_18 = arith.constant 5.000000e-01 : f32
    %20 = vector.broadcast %cst_18 : f32 to vector<1x256xf32>
    %21 = arith.cmpf ogt, %19, %20 : vector<1x256xf32>
    %cst_19 = arith.constant -1.000000e+30 : f32
    %22 = vector.shape_cast %21 : vector<1x256xi1> to vector<1x256xi1>
    %23 = vector.broadcast %22 : vector<1x256xi1> to vector<4x256xi1>
    %24 = vector.broadcast %cst_19 : f32 to vector<4x256xf32>
    %25 = arith.select %23, %6, %24 : vector<4x256xi1>, vector<4x256xf32>
    %cst_20 = arith.constant dense<0xFF800000> : vector<4xf32>
    %26 = vector.multi_reduction <maximumf>, %25, %cst_20 [1] : vector<4x256xf32> to vector<4xf32>
    %27 = vector.shape_cast %26 : vector<4xf32> to vector<4x1xf32>
    %c0_21 = arith.constant 0 : index
    %c0_22 = arith.constant 0 : index
    %28 = vector.load %arg7[%c0_21, %c0_22] : memref<4x196xf32, #tpu.memory_space<vmem>>, vector<1x196xf32>
    %29 = vector.broadcast %27 : vector<4x1xf32> to vector<4x196xf32>
    %30 = vector.broadcast %28 : vector<1x196xf32> to vector<4x196xf32>
    %31 = arith.mulf %29, %30 : vector<4x196xf32>
    %c1 = arith.constant 1 : index
    %c0_23 = arith.constant 0 : index
    %32 = vector.load %arg6[%c1, %c0_23] : memref<4x256xf32, #tpu.memory_space<vmem>>, vector<1x256xf32>
    %cst_24 = arith.constant 5.000000e-01 : f32
    %33 = vector.broadcast %cst_24 : f32 to vector<1x256xf32>
    %34 = arith.cmpf ogt, %32, %33 : vector<1x256xf32>
    %cst_25 = arith.constant -1.000000e+30 : f32
    %35 = vector.shape_cast %34 : vector<1x256xi1> to vector<1x256xi1>
    %36 = vector.broadcast %35 : vector<1x256xi1> to vector<4x256xi1>
    %37 = vector.broadcast %cst_25 : f32 to vector<4x256xf32>
    %38 = arith.select %36, %6, %37 : vector<4x256xi1>, vector<4x256xf32>
    %cst_26 = arith.constant dense<0xFF800000> : vector<4xf32>
    %39 = vector.multi_reduction <maximumf>, %38, %cst_26 [1] : vector<4x256xf32> to vector<4xf32>
    %40 = vector.shape_cast %39 : vector<4xf32> to vector<4x1xf32>
    %c1_27 = arith.constant 1 : index
    %c0_28 = arith.constant 0 : index
    %41 = vector.load %arg7[%c1_27, %c0_28] : memref<4x196xf32, #tpu.memory_space<vmem>>, vector<1x196xf32>
    %42 = vector.broadcast %40 : vector<4x1xf32> to vector<4x196xf32>
    %43 = vector.broadcast %41 : vector<1x196xf32> to vector<4x196xf32>
    %44 = arith.mulf %42, %43 : vector<4x196xf32>
    %45 = arith.addf %31, %44 : vector<4x196xf32>
    %c2 = arith.constant 2 : index
    %c0_29 = arith.constant 0 : index
    %46 = vector.load %arg6[%c2, %c0_29] : memref<4x256xf32, #tpu.memory_space<vmem>>, vector<1x256xf32>
    %cst_30 = arith.constant 5.000000e-01 : f32
    %47 = vector.broadcast %cst_30 : f32 to vector<1x256xf32>
    %48 = arith.cmpf ogt, %46, %47 : vector<1x256xf32>
    %cst_31 = arith.constant -1.000000e+30 : f32
    %49 = vector.shape_cast %48 : vector<1x256xi1> to vector<1x256xi1>
    %50 = vector.broadcast %49 : vector<1x256xi1> to vector<4x256xi1>
    %51 = vector.broadcast %cst_31 : f32 to vector<4x256xf32>
    %52 = arith.select %50, %6, %51 : vector<4x256xi1>, vector<4x256xf32>
    %cst_32 = arith.constant dense<0xFF800000> : vector<4xf32>
    %53 = vector.multi_reduction <maximumf>, %52, %cst_32 [1] : vector<4x256xf32> to vector<4xf32>
    %54 = vector.shape_cast %53 : vector<4xf32> to vector<4x1xf32>
    %c2_33 = arith.constant 2 : index
    %c0_34 = arith.constant 0 : index
    %55 = vector.load %arg7[%c2_33, %c0_34] : memref<4x196xf32, #tpu.memory_space<vmem>>, vector<1x196xf32>
    %56 = vector.broadcast %54 : vector<4x1xf32> to vector<4x196xf32>
    %57 = vector.broadcast %55 : vector<1x196xf32> to vector<4x196xf32>
    %58 = arith.mulf %56, %57 : vector<4x196xf32>
    %59 = arith.addf %45, %58 : vector<4x196xf32>
    %c3 = arith.constant 3 : index
    %c0_35 = arith.constant 0 : index
    %60 = vector.load %arg6[%c3, %c0_35] : memref<4x256xf32, #tpu.memory_space<vmem>>, vector<1x256xf32>
    %cst_36 = arith.constant 5.000000e-01 : f32
    %61 = vector.broadcast %cst_36 : f32 to vector<1x256xf32>
    %62 = arith.cmpf ogt, %60, %61 : vector<1x256xf32>
    %cst_37 = arith.constant -1.000000e+30 : f32
    %63 = vector.shape_cast %62 : vector<1x256xi1> to vector<1x256xi1>
    %64 = vector.broadcast %63 : vector<1x256xi1> to vector<4x256xi1>
    %65 = vector.broadcast %cst_37 : f32 to vector<4x256xf32>
    %66 = arith.select %64, %6, %65 : vector<4x256xi1>, vector<4x256xf32>
    %cst_38 = arith.constant dense<0xFF800000> : vector<4xf32>
    %67 = vector.multi_reduction <maximumf>, %66, %cst_38 [1] : vector<4x256xf32> to vector<4xf32>
    %68 = vector.shape_cast %67 : vector<4xf32> to vector<4x1xf32>
    %c3_39 = arith.constant 3 : index
    %c0_40 = arith.constant 0 : index
    %69 = vector.load %arg7[%c3_39, %c0_40] : memref<4x196xf32, #tpu.memory_space<vmem>>, vector<1x196xf32>
    %70 = vector.broadcast %68 : vector<4x1xf32> to vector<4x196xf32>
    %71 = vector.broadcast %69 : vector<1x196xf32> to vector<4x196xf32>
    %72 = arith.mulf %70, %71 : vector<4x196xf32>
    %73 = arith.addf %59, %72 : vector<4x196xf32>
    %c0_41 = arith.constant 0 : index
    %c0_42 = arith.constant 0 : index
    %c0_43 = arith.constant 0 : index
    %74 = vector.load %arg9[%c0_41, %c0_42, %c0_43] : memref<8x4x196xf32, #tpu.memory_space<vmem>>, vector<1x4x196xf32>
    %75 = vector.shape_cast %74 : vector<1x4x196xf32> to vector<4x196xf32>
    %76 = vector.extract_strided_slice %73 {offsets = [0, 0], sizes = [1, 196], strides = [1, 1]} : vector<4x196xf32> to vector<1x196xf32>
    %77 = vector.broadcast %76 : vector<1x196xf32> to vector<4x196xf32>
    %78 = arith.mulf %75, %77 : vector<4x196xf32>
    %c1_44 = arith.constant 1 : index
    %c0_45 = arith.constant 0 : index
    %c0_46 = arith.constant 0 : index
    %79 = vector.load %arg9[%c1_44, %c0_45, %c0_46] : memref<8x4x196xf32, #tpu.memory_space<vmem>>, vector<1x4x196xf32>
    %80 = vector.shape_cast %79 : vector<1x4x196xf32> to vector<4x196xf32>
    %81 = vector.extract_strided_slice %73 {offsets = [1, 0], sizes = [1, 196], strides = [1, 1]} : vector<4x196xf32> to vector<1x196xf32>
    %82 = vector.broadcast %81 : vector<1x196xf32> to vector<4x196xf32>
    %83 = arith.mulf %80, %82 : vector<4x196xf32>
    %84 = arith.addf %78, %83 : vector<4x196xf32>
    %c2_47 = arith.constant 2 : index
    %c0_48 = arith.constant 0 : index
    %c0_49 = arith.constant 0 : index
    %85 = vector.load %arg9[%c2_47, %c0_48, %c0_49] : memref<8x4x196xf32, #tpu.memory_space<vmem>>, vector<1x4x196xf32>
    %86 = vector.shape_cast %85 : vector<1x4x196xf32> to vector<4x196xf32>
    %87 = vector.extract_strided_slice %73 {offsets = [2, 0], sizes = [1, 196], strides = [1, 1]} : vector<4x196xf32> to vector<1x196xf32>
    %88 = vector.broadcast %87 : vector<1x196xf32> to vector<4x196xf32>
    %89 = arith.mulf %86, %88 : vector<4x196xf32>
    %90 = arith.addf %84, %89 : vector<4x196xf32>
    %c3_50 = arith.constant 3 : index
    %c0_51 = arith.constant 0 : index
    %c0_52 = arith.constant 0 : index
    %91 = vector.load %arg9[%c3_50, %c0_51, %c0_52] : memref<8x4x196xf32, #tpu.memory_space<vmem>>, vector<1x4x196xf32>
    %92 = vector.shape_cast %91 : vector<1x4x196xf32> to vector<4x196xf32>
    %93 = vector.extract_strided_slice %73 {offsets = [3, 0], sizes = [1, 196], strides = [1, 1]} : vector<4x196xf32> to vector<1x196xf32>
    %94 = vector.broadcast %93 : vector<1x196xf32> to vector<4x196xf32>
    %95 = arith.mulf %92, %94 : vector<4x196xf32>
    %96 = arith.addf %90, %95 : vector<4x196xf32>
    %c4 = arith.constant 4 : index
    %c0_53 = arith.constant 0 : index
    %c0_54 = arith.constant 0 : index
    %97 = vector.load %arg9[%c4, %c0_53, %c0_54] : memref<8x4x196xf32, #tpu.memory_space<vmem>>, vector<1x4x196xf32>
    %98 = vector.shape_cast %97 : vector<1x4x196xf32> to vector<4x196xf32>
    %99 = vector.extract_strided_slice %18 {offsets = [0, 0], sizes = [1, 196], strides = [1, 1]} : vector<4x196xf32> to vector<1x196xf32>
    %100 = vector.broadcast %99 : vector<1x196xf32> to vector<4x196xf32>
    %101 = arith.mulf %98, %100 : vector<4x196xf32>
    %102 = arith.addf %96, %101 : vector<4x196xf32>
    %c5 = arith.constant 5 : index
    %c0_55 = arith.constant 0 : index
    %c0_56 = arith.constant 0 : index
    %103 = vector.load %arg9[%c5, %c0_55, %c0_56] : memref<8x4x196xf32, #tpu.memory_space<vmem>>, vector<1x4x196xf32>
    %104 = vector.shape_cast %103 : vector<1x4x196xf32> to vector<4x196xf32>
    %105 = vector.extract_strided_slice %18 {offsets = [1, 0], sizes = [1, 196], strides = [1, 1]} : vector<4x196xf32> to vector<1x196xf32>
    %106 = vector.broadcast %105 : vector<1x196xf32> to vector<4x196xf32>
    %107 = arith.mulf %104, %106 : vector<4x196xf32>
    %108 = arith.addf %102, %107 : vector<4x196xf32>
    %c6 = arith.constant 6 : index
    %c0_57 = arith.constant 0 : index
    %c0_58 = arith.constant 0 : index
    %109 = vector.load %arg9[%c6, %c0_57, %c0_58] : memref<8x4x196xf32, #tpu.memory_space<vmem>>, vector<1x4x196xf32>
    %110 = vector.shape_cast %109 : vector<1x4x196xf32> to vector<4x196xf32>
    %111 = vector.extract_strided_slice %18 {offsets = [2, 0], sizes = [1, 196], strides = [1, 1]} : vector<4x196xf32> to vector<1x196xf32>
    %112 = vector.broadcast %111 : vector<1x196xf32> to vector<4x196xf32>
    %113 = arith.mulf %110, %112 : vector<4x196xf32>
    %114 = arith.addf %108, %113 : vector<4x196xf32>
    %c7 = arith.constant 7 : index
    %c0_59 = arith.constant 0 : index
    %c0_60 = arith.constant 0 : index
    %115 = vector.load %arg9[%c7, %c0_59, %c0_60] : memref<8x4x196xf32, #tpu.memory_space<vmem>>, vector<1x4x196xf32>
    %116 = vector.shape_cast %115 : vector<1x4x196xf32> to vector<4x196xf32>
    %117 = vector.extract_strided_slice %18 {offsets = [3, 0], sizes = [1, 196], strides = [1, 1]} : vector<4x196xf32> to vector<1x196xf32>
    %118 = vector.broadcast %117 : vector<1x196xf32> to vector<4x196xf32>
    %119 = arith.mulf %116, %118 : vector<4x196xf32>
    %120 = arith.addf %114, %119 : vector<4x196xf32>
    %c0_61 = arith.constant 0 : index
    %c0_62 = arith.constant 0 : index
    %121 = vector.load %arg10[%c0_61, %c0_62] : memref<196x256xf32, #tpu.memory_space<vmem>>, vector<196x256xf32>
    %cst_63 = arith.constant dense<0.000000e+00> : vector<4x256xf32>
    %122 = tpu.matmul %120, %121, %cst_63 {dimension_numbers = #tpu.dot_dimension_numbers<[1], [0], [0], [1], [0, 0, 1, 1], [], []>} : vector<4x196xf32>, vector<196x256xf32>, vector<4x256xf32> -> vector<4x256xf32>
    %c0_64 = arith.constant 0 : index
    %c0_65 = arith.constant 0 : index
    %123 = vector.load %arg11[%c0_64, %c0_65] : memref<4x1xf32, #tpu.memory_space<vmem>>, vector<4x1xf32>
    %124 = vector.broadcast %123 : vector<4x1xf32> to vector<4x256xf32>
    %125 = arith.addf %122, %124 : vector<4x256xf32>
    %c0_66 = arith.constant 0 : index
    %c0_67 = arith.constant 0 : index
    %126 = vector.load %arg12[%c0_66, %c0_67] : memref<64x4xf32, #tpu.memory_space<vmem>>, vector<64x4xf32>
    %127 = arith.addf %16, %125 : vector<4x256xf32>
    %cst_68 = arith.constant dense<0.000000e+00> : vector<64x256xf32>
    %128 = tpu.matmul %126, %127, %cst_68 {dimension_numbers = #tpu.dot_dimension_numbers<[1], [0], [0], [1], [0, 0, 1, 1], [], []>} : vector<64x4xf32>, vector<4x256xf32>, vector<64x256xf32> -> vector<64x256xf32>
    %c0_69 = arith.constant 0 : index
    %c0_70 = arith.constant 0 : index
    %129 = vector.load %arg13[%c0_69, %c0_70] : memref<64x1xf32, #tpu.memory_space<vmem>>, vector<64x1xf32>
    %130 = vector.broadcast %129 : vector<64x1xf32> to vector<64x256xf32>
    %131 = arith.addf %128, %130 : vector<64x256xf32>
    %132 = arith.negf %131 : vector<64x256xf32>
    %133 = math.exp %132 : vector<64x256xf32>
    %cst_71 = arith.constant 1.000000e+00 : f32
    %134 = vector.broadcast %cst_71 : f32 to vector<64x256xf32>
    %135 = arith.addf %134, %133 : vector<64x256xf32>
    %136 = arith.divf %134, %135 : vector<64x256xf32>
    %137 = arith.mulf %1, %136 : vector<64x256xf32>
    %c0_72 = arith.constant 0 : index
    %c0_73 = arith.constant 0 : index
    %c0_74 = arith.constant 0 : index
    %138 = vector.load %arg14[%c0_72, %c0_73, %c0_74] : memref<2x64x256xf32, #tpu.memory_space<vmem>>, vector<1x64x256xf32>
    %139 = vector.shape_cast %138 : vector<1x64x256xf32> to vector<64x256xf32>
    %140 = vector.shape_cast %137 : vector<64x256xf32> to vector<1x64x256xf32>
    tpu.vector_store %arg14[%c0_72, %c0_73, %c0_74], %140 {strides = array<i32>} : memref<2x64x256xf32, #tpu.memory_space<vmem>>, vector<1x64x256xf32>,
    %c1_75 = arith.constant 1 : index
    %c0_76 = arith.constant 0 : index
    %c0_77 = arith.constant 0 : index
    %141 = vector.load %arg1[%c1_75, %c0_76, %c0_77] : memref<2x64x256xf32, #tpu.memory_space<vmem>>, vector<1x64x256xf32>
    %142 = vector.shape_cast %141 : vector<1x64x256xf32> to vector<64x256xf32>
    %c0_78 = arith.constant 0 : index
    %c0_79 = arith.constant 0 : index
    %143 = vector.load %arg2[%c0_78, %c0_79] : memref<4x64xf32, #tpu.memory_space<vmem>>, vector<4x64xf32>
    %cst_80 = arith.constant dense<0.000000e+00> : vector<4x256xf32>
    %144 = tpu.matmul %143, %142, %cst_80 {dimension_numbers = #tpu.dot_dimension_numbers<[1], [0], [0], [1], [0, 0, 1, 1], [], []>} : vector<4x64xf32>, vector<64x256xf32>, vector<4x256xf32> -> vector<4x256xf32>
    %c0_81 = arith.constant 0 : index
    %c0_82 = arith.constant 0 : index
    %145 = vector.load %arg3[%c0_81, %c0_82] : memref<4x1xf32, #tpu.memory_space<vmem>>, vector<4x1xf32>
    %146 = vector.broadcast %145 : vector<4x1xf32> to vector<4x256xf32>
    %147 = arith.addf %144, %146 : vector<4x256xf32>
    %cst_83 = arith.constant dense<0.000000e+00> : vector<4xf32>
    %148 = vector.multi_reduction <add>, %147, %cst_83 [1] : vector<4x256xf32> to vector<4xf32>
    %149 = vector.shape_cast %148 : vector<4xf32> to vector<4x1xf32>
    %cst_84 = arith.constant 3.906250e-03 : f32
    %150 = vector.broadcast %cst_84 : f32 to vector<4x1xf32>
    %151 = arith.mulf %149, %150 : vector<4x1xf32>
    %c0_85 = arith.constant 0 : index
    %c0_86 = arith.constant 0 : index
    %152 = vector.load %arg4[%c0_85, %c0_86] : memref<4x4xf32, #tpu.memory_space<vmem>>, vector<4x4xf32>
    %cst_87 = arith.constant dense<0.000000e+00> : vector<4x1xf32>
    %153 = tpu.matmul %152, %151, %cst_87 {dimension_numbers = #tpu.dot_dimension_numbers<[1], [0], [0], [1], [0, 0, 1, 1], [], []>} : vector<4x4xf32>, vector<4x1xf32>, vector<4x1xf32> -> vector<4x1xf32>
    %c0_88 = arith.constant 0 : index
    %c0_89 = arith.constant 0 : index
    %154 = vector.load %arg5[%c0_88, %c0_89] : memref<4x1xf32, #tpu.memory_space<vmem>>, vector<4x1xf32>
    %155 = arith.addf %153, %154 : vector<4x1xf32>
    %156 = vector.broadcast %155 : vector<4x1xf32> to vector<4x256xf32>
    %157 = arith.mulf %147, %156 : vector<4x256xf32>
    %c0_90 = arith.constant 0 : index
    %c0_91 = arith.constant 0 : index
    %158 = vector.load %arg8[%c0_90, %c0_91] : memref<256x196xf32, #tpu.memory_space<vmem>>, vector<256x196xf32>
    %cst_92 = arith.constant dense<0.000000e+00> : vector<4x196xf32>
    %159 = tpu.matmul %147, %158, %cst_92 {dimension_numbers = #tpu.dot_dimension_numbers<[1], [0], [0], [1], [0, 0, 1, 1], [], []>} : vector<4x256xf32>, vector<256x196xf32>, vector<4x196xf32> -> vector<4x196xf32>
    %c0_93 = arith.constant 0 : index
    %c0_94 = arith.constant 0 : index
    %160 = vector.load %arg6[%c0_93, %c0_94] : memref<4x256xf32, #tpu.memory_space<vmem>>, vector<1x256xf32>
    %cst_95 = arith.constant 5.000000e-01 : f32
    %161 = vector.broadcast %cst_95 : f32 to vector<1x256xf32>
    %162 = arith.cmpf ogt, %160, %161 : vector<1x256xf32>
    %cst_96 = arith.constant -1.000000e+30 : f32
    %163 = vector.shape_cast %162 : vector<1x256xi1> to vector<1x256xi1>
    %164 = vector.broadcast %163 : vector<1x256xi1> to vector<4x256xi1>
    %165 = vector.broadcast %cst_96 : f32 to vector<4x256xf32>
    %166 = arith.select %164, %147, %165 : vector<4x256xi1>, vector<4x256xf32>
    %cst_97 = arith.constant dense<0xFF800000> : vector<4xf32>
    %167 = vector.multi_reduction <maximumf>, %166, %cst_97 [1] : vector<4x256xf32> to vector<4xf32>
    %168 = vector.shape_cast %167 : vector<4xf32> to vector<4x1xf32>
    %c0_98 = arith.constant 0 : index
    %c0_99 = arith.constant 0 : index
    %169 = vector.load %arg7[%c0_98, %c0_99] : memref<4x196xf32, #tpu.memory_space<vmem>>, vector<1x196xf32>
    %170 = vector.broadcast %168 : vector<4x1xf32> to vector<4x196xf32>
    %171 = vector.broadcast %169 : vector<1x196xf32> to vector<4x196xf32>
    %172 = arith.mulf %170, %171 : vector<4x196xf32>
    %c1_100 = arith.constant 1 : index
    %c0_101 = arith.constant 0 : index
    %173 = vector.load %arg6[%c1_100, %c0_101] : memref<4x256xf32, #tpu.memory_space<vmem>>, vector<1x256xf32>
    %cst_102 = arith.constant 5.000000e-01 : f32
    %174 = vector.broadcast %cst_102 : f32 to vector<1x256xf32>
    %175 = arith.cmpf ogt, %173, %174 : vector<1x256xf32>
    %cst_103 = arith.constant -1.000000e+30 : f32
    %176 = vector.shape_cast %175 : vector<1x256xi1> to vector<1x256xi1>
    %177 = vector.broadcast %176 : vector<1x256xi1> to vector<4x256xi1>
    %178 = vector.broadcast %cst_103 : f32 to vector<4x256xf32>
    %179 = arith.select %177, %147, %178 : vector<4x256xi1>, vector<4x256xf32>
    %cst_104 = arith.constant dense<0xFF800000> : vector<4xf32>
    %180 = vector.multi_reduction <maximumf>, %179, %cst_104 [1] : vector<4x256xf32> to vector<4xf32>
    %181 = vector.shape_cast %180 : vector<4xf32> to vector<4x1xf32>
    %c1_105 = arith.constant 1 : index
    %c0_106 = arith.constant 0 : index
    %182 = vector.load %arg7[%c1_105, %c0_106] : memref<4x196xf32, #tpu.memory_space<vmem>>, vector<1x196xf32>
    %183 = vector.broadcast %181 : vector<4x1xf32> to vector<4x196xf32>
    %184 = vector.broadcast %182 : vector<1x196xf32> to vector<4x196xf32>
    %185 = arith.mulf %183, %184 : vector<4x196xf32>
    %186 = arith.addf %172, %185 : vector<4x196xf32>
    %c2_107 = arith.constant 2 : index
    %c0_108 = arith.constant 0 : index
    %187 = vector.load %arg6[%c2_107, %c0_108] : memref<4x256xf32, #tpu.memory_space<vmem>>, vector<1x256xf32>
    %cst_109 = arith.constant 5.000000e-01 : f32
    %188 = vector.broadcast %cst_109 : f32 to vector<1x256xf32>
    %189 = arith.cmpf ogt, %187, %188 : vector<1x256xf32>
    %cst_110 = arith.constant -1.000000e+30 : f32
    %190 = vector.shape_cast %189 : vector<1x256xi1> to vector<1x256xi1>
    %191 = vector.broadcast %190 : vector<1x256xi1> to vector<4x256xi1>
    %192 = vector.broadcast %cst_110 : f32 to vector<4x256xf32>
    %193 = arith.select %191, %147, %192 : vector<4x256xi1>, vector<4x256xf32>
    %cst_111 = arith.constant dense<0xFF800000> : vector<4xf32>
    %194 = vector.multi_reduction <maximumf>, %193, %cst_111 [1] : vector<4x256xf32> to vector<4xf32>
    %195 = vector.shape_cast %194 : vector<4xf32> to vector<4x1xf32>
    %c2_112 = arith.constant 2 : index
    %c0_113 = arith.constant 0 : index
    %196 = vector.load %arg7[%c2_112, %c0_113] : memref<4x196xf32, #tpu.memory_space<vmem>>, vector<1x196xf32>
    %197 = vector.broadcast %195 : vector<4x1xf32> to vector<4x196xf32>
    %198 = vector.broadcast %196 : vector<1x196xf32> to vector<4x196xf32>
    %199 = arith.mulf %197, %198 : vector<4x196xf32>
    %200 = arith.addf %186, %199 : vector<4x196xf32>
    %c3_114 = arith.constant 3 : index
    %c0_115 = arith.constant 0 : index
    %201 = vector.load %arg6[%c3_114, %c0_115] : memref<4x256xf32, #tpu.memory_space<vmem>>, vector<1x256xf32>
    %cst_116 = arith.constant 5.000000e-01 : f32
    %202 = vector.broadcast %cst_116 : f32 to vector<1x256xf32>
    %203 = arith.cmpf ogt, %201, %202 : vector<1x256xf32>
    %cst_117 = arith.constant -1.000000e+30 : f32
    %204 = vector.shape_cast %203 : vector<1x256xi1> to vector<1x256xi1>
    %205 = vector.broadcast %204 : vector<1x256xi1> to vector<4x256xi1>
    %206 = vector.broadcast %cst_117 : f32 to vector<4x256xf32>
    %207 = arith.select %205, %147, %206 : vector<4x256xi1>, vector<4x256xf32>
    %cst_118 = arith.constant dense<0xFF800000> : vector<4xf32>
    %208 = vector.multi_reduction <maximumf>, %207, %cst_118 [1] : vector<4x256xf32> to vector<4xf32>
    %209 = vector.shape_cast %208 : vector<4xf32> to vector<4x1xf32>
    %c3_119 = arith.constant 3 : index
    %c0_120 = arith.constant 0 : index
    %210 = vector.load %arg7[%c3_119, %c0_120] : memref<4x196xf32, #tpu.memory_space<vmem>>, vector<1x196xf32>
    %211 = vector.broadcast %209 : vector<4x1xf32> to vector<4x196xf32>
    %212 = vector.broadcast %210 : vector<1x196xf32> to vector<4x196xf32>
    %213 = arith.mulf %211, %212 : vector<4x196xf32>
    %214 = arith.addf %200, %213 : vector<4x196xf32>
    %c0_121 = arith.constant 0 : index
    %c0_122 = arith.constant 0 : index
    %c0_123 = arith.constant 0 : index
    %215 = vector.load %arg9[%c0_121, %c0_122, %c0_123] : memref<8x4x196xf32, #tpu.memory_space<vmem>>, vector<1x4x196xf32>
    %216 = vector.shape_cast %215 : vector<1x4x196xf32> to vector<4x196xf32>
    %217 = vector.extract_strided_slice %214 {offsets = [0, 0], sizes = [1, 196], strides = [1, 1]} : vector<4x196xf32> to vector<1x196xf32>
    %218 = vector.broadcast %217 : vector<1x196xf32> to vector<4x196xf32>
    %219 = arith.mulf %216, %218 : vector<4x196xf32>
    %c1_124 = arith.constant 1 : index
    %c0_125 = arith.constant 0 : index
    %c0_126 = arith.constant 0 : index
    %220 = vector.load %arg9[%c1_124, %c0_125, %c0_126] : memref<8x4x196xf32, #tpu.memory_space<vmem>>, vector<1x4x196xf32>
    %221 = vector.shape_cast %220 : vector<1x4x196xf32> to vector<4x196xf32>
    %222 = vector.extract_strided_slice %214 {offsets = [1, 0], sizes = [1, 196], strides = [1, 1]} : vector<4x196xf32> to vector<1x196xf32>
    %223 = vector.broadcast %222 : vector<1x196xf32> to vector<4x196xf32>
    %224 = arith.mulf %221, %223 : vector<4x196xf32>
    %225 = arith.addf %219, %224 : vector<4x196xf32>
    %c2_127 = arith.constant 2 : index
    %c0_128 = arith.constant 0 : index
    %c0_129 = arith.constant 0 : index
    %226 = vector.load %arg9[%c2_127, %c0_128, %c0_129] : memref<8x4x196xf32, #tpu.memory_space<vmem>>, vector<1x4x196xf32>
    %227 = vector.shape_cast %226 : vector<1x4x196xf32> to vector<4x196xf32>
    %228 = vector.extract_strided_slice %214 {offsets = [2, 0], sizes = [1, 196], strides = [1, 1]} : vector<4x196xf32> to vector<1x196xf32>
    %229 = vector.broadcast %228 : vector<1x196xf32> to vector<4x196xf32>
    %230 = arith.mulf %227, %229 : vector<4x196xf32>
    %231 = arith.addf %225, %230 : vector<4x196xf32>
    %c3_130 = arith.constant 3 : index
    %c0_131 = arith.constant 0 : index
    %c0_132 = arith.constant 0 : index
    %232 = vector.load %arg9[%c3_130, %c0_131, %c0_132] : memref<8x4x196xf32, #tpu.memory_space<vmem>>, vector<1x4x196xf32>
    %233 = vector.shape_cast %232 : vector<1x4x196xf32> to vector<4x196xf32>
    %234 = vector.extract_strided_slice %214 {offsets = [3, 0], sizes = [1, 196], strides = [1, 1]} : vector<4x196xf32> to vector<1x196xf32>
    %235 = vector.broadcast %234 : vector<1x196xf32> to vector<4x196xf32>
    %236 = arith.mulf %233, %235 : vector<4x196xf32>
    %237 = arith.addf %231, %236 : vector<4x196xf32>
    %c4_133 = arith.constant 4 : index
    %c0_134 = arith.constant 0 : index
    %c0_135 = arith.constant 0 : index
    %238 = vector.load %arg9[%c4_133, %c0_134, %c0_135] : memref<8x4x196xf32, #tpu.memory_space<vmem>>, vector<1x4x196xf32>
    %239 = vector.shape_cast %238 : vector<1x4x196xf32> to vector<4x196xf32>
    %240 = vector.extract_strided_slice %159 {offsets = [0, 0], sizes = [1, 196], strides = [1, 1]} : vector<4x196xf32> to vector<1x196xf32>
    %241 = vector.broadcast %240 : vector<1x196xf32> to vector<4x196xf32>
    %242 = arith.mulf %239, %241 : vector<4x196xf32>
    %243 = arith.addf %237, %242 : vector<4x196xf32>
    %c5_136 = arith.constant 5 : index
    %c0_137 = arith.constant 0 : index
    %c0_138 = arith.constant 0 : index
    %244 = vector.load %arg9[%c5_136, %c0_137, %c0_138] : memref<8x4x196xf32, #tpu.memory_space<vmem>>, vector<1x4x196xf32>
    %245 = vector.shape_cast %244 : vector<1x4x196xf32> to vector<4x196xf32>
    %246 = vector.extract_strided_slice %159 {offsets = [1, 0], sizes = [1, 196], strides = [1, 1]} : vector<4x196xf32> to vector<1x196xf32>
    %247 = vector.broadcast %246 : vector<1x196xf32> to vector<4x196xf32>
    %248 = arith.mulf %245, %247 : vector<4x196xf32>
    %249 = arith.addf %243, %248 : vector<4x196xf32>
    %c6_139 = arith.constant 6 : index
    %c0_140 = arith.constant 0 : index
    %c0_141 = arith.constant 0 : index
    %250 = vector.load %arg9[%c6_139, %c0_140, %c0_141] : memref<8x4x196xf32, #tpu.memory_space<vmem>>, vector<1x4x196xf32>
    %251 = vector.shape_cast %250 : vector<1x4x196xf32> to vector<4x196xf32>
    %252 = vector.extract_strided_slice %159 {offsets = [2, 0], sizes = [1, 196], strides = [1, 1]} : vector<4x196xf32> to vector<1x196xf32>
    %253 = vector.broadcast %252 : vector<1x196xf32> to vector<4x196xf32>
    %254 = arith.mulf %251, %253 : vector<4x196xf32>
    %255 = arith.addf %249, %254 : vector<4x196xf32>
    %c7_142 = arith.constant 7 : index
    %c0_143 = arith.constant 0 : index
    %c0_144 = arith.constant 0 : index
    %256 = vector.load %arg9[%c7_142, %c0_143, %c0_144] : memref<8x4x196xf32, #tpu.memory_space<vmem>>, vector<1x4x196xf32>
    %257 = vector.shape_cast %256 : vector<1x4x196xf32> to vector<4x196xf32>
    %258 = vector.extract_strided_slice %159 {offsets = [3, 0], sizes = [1, 196], strides = [1, 1]} : vector<4x196xf32> to vector<1x196xf32>
    %259 = vector.broadcast %258 : vector<1x196xf32> to vector<4x196xf32>
    %260 = arith.mulf %257, %259 : vector<4x196xf32>
    %261 = arith.addf %255, %260 : vector<4x196xf32>
    %c0_145 = arith.constant 0 : index
    %c0_146 = arith.constant 0 : index
    %262 = vector.load %arg10[%c0_145, %c0_146] : memref<196x256xf32, #tpu.memory_space<vmem>>, vector<196x256xf32>
    %cst_147 = arith.constant dense<0.000000e+00> : vector<4x256xf32>
    %263 = tpu.matmul %261, %262, %cst_147 {dimension_numbers = #tpu.dot_dimension_numbers<[1], [0], [0], [1], [0, 0, 1, 1], [], []>} : vector<4x196xf32>, vector<196x256xf32>, vector<4x256xf32> -> vector<4x256xf32>
    %c0_148 = arith.constant 0 : index
    %c0_149 = arith.constant 0 : index
    %264 = vector.load %arg11[%c0_148, %c0_149] : memref<4x1xf32, #tpu.memory_space<vmem>>, vector<4x1xf32>
    %265 = vector.broadcast %264 : vector<4x1xf32> to vector<4x256xf32>
    %266 = arith.addf %263, %265 : vector<4x256xf32>
    %c0_150 = arith.constant 0 : index
    %c0_151 = arith.constant 0 : index
    %267 = vector.load %arg12[%c0_150, %c0_151] : memref<64x4xf32, #tpu.memory_space<vmem>>, vector<64x4xf32>
    %268 = arith.addf %157, %266 : vector<4x256xf32>
    %cst_152 = arith.constant dense<0.000000e+00> : vector<64x256xf32>
    %269 = tpu.matmul %267, %268, %cst_152 {dimension_numbers = #tpu.dot_dimension_numbers<[1], [0], [0], [1], [0, 0, 1, 1], [], []>} : vector<64x4xf32>, vector<4x256xf32>, vector<64x256xf32> -> vector<64x256xf32>
    %c0_153 = arith.constant 0 : index
    %c0_154 = arith.constant 0 : index
    %270 = vector.load %arg13[%c0_153, %c0_154] : memref<64x1xf32, #tpu.memory_space<vmem>>, vector<64x1xf32>
    %271 = vector.broadcast %270 : vector<64x1xf32> to vector<64x256xf32>
    %272 = arith.addf %269, %271 : vector<64x256xf32>
    %273 = arith.negf %272 : vector<64x256xf32>
    %274 = math.exp %273 : vector<64x256xf32>
    %cst_155 = arith.constant 1.000000e+00 : f32
    %275 = vector.broadcast %cst_155 : f32 to vector<64x256xf32>
    %276 = arith.addf %275, %274 : vector<64x256xf32>
    %277 = arith.divf %275, %276 : vector<64x256xf32>
    %278 = arith.mulf %142, %277 : vector<64x256xf32>
    %c1_156 = arith.constant 1 : index
    %c0_157 = arith.constant 0 : index
    %c0_158 = arith.constant 0 : index
    %279 = vector.load %arg14[%c1_156, %c0_157, %c0_158] : memref<2x64x256xf32, #tpu.memory_space<vmem>>, vector<1x64x256xf32>
    %280 = vector.shape_cast %279 : vector<1x64x256xf32> to vector<64x256xf32>
    %281 = vector.shape_cast %278 : vector<64x256xf32> to vector<1x64x256xf32>
    tpu.vector_store %arg14[%c1_156, %c0_157, %c0_158], %281 {strides = array<i32>} : memref<2x64x256xf32, #tpu.memory_space<vmem>>, vector<1x64x256xf32>,
    return
  }
  func.func @transform_0(%arg0: i32) -> (i32, i32, i32) {
    %c0_i32 = arith.constant 0 : i32
    %c0_i32_0 = arith.constant 0 : i32
    %c0_i32_1 = arith.constant 0 : i32
    return %arg0, %c0_i32, %c0_i32_0 : i32, i32, i32
  }
  func.func @transform_1(%arg0: i32) -> (i32, i32) {
    %c0_i32 = arith.constant 0 : i32
    %c0_i32_0 = arith.constant 0 : i32
    %c0_i32_1 = arith.constant 0 : i32
    return %c0_i32, %c0_i32_0 : i32, i32
  }
  func.func @transform_2(%arg0: i32) -> (i32, i32) {
    %c0_i32 = arith.constant 0 : i32
    %c0_i32_0 = arith.constant 0 : i32
    %c0_i32_1 = arith.constant 0 : i32
    return %c0_i32, %c0_i32_0 : i32, i32
  }
  func.func @transform_3(%arg0: i32) -> (i32, i32) {
    %c0_i32 = arith.constant 0 : i32
    %c0_i32_0 = arith.constant 0 : i32
    %c0_i32_1 = arith.constant 0 : i32
    return %c0_i32, %c0_i32_0 : i32, i32
  }
  func.func @transform_4(%arg0: i32) -> (i32, i32) {
    %c0_i32 = arith.constant 0 : i32
    %c0_i32_0 = arith.constant 0 : i32
    %c0_i32_1 = arith.constant 0 : i32
    return %c0_i32, %c0_i32_0 : i32, i32
  }
  func.func @transform_5(%arg0: i32) -> (i32, i32) {
    %c0_i32 = arith.constant 0 : i32
    %c0_i32_0 = arith.constant 0 : i32
    %c0_i32_1 = arith.constant 0 : i32
    return %c0_i32, %c0_i32_0 : i32, i32
  }
  func.func @transform_6(%arg0: i32) -> (i32, i32) {
    %c0_i32 = arith.constant 0 : i32
    %c0_i32_0 = arith.constant 0 : i32
    %c0_i32_1 = arith.constant 0 : i32
    return %c0_i32, %c0_i32_0 : i32, i32
  }
  func.func @transform_7(%arg0: i32) -> (i32, i32) {
    %c0_i32 = arith.constant 0 : i32
    %c0_i32_0 = arith.constant 0 : i32
    %c0_i32_1 = arith.constant 0 : i32
    return %c0_i32, %c0_i32_0 : i32, i32
  }
  func.func @transform_8(%arg0: i32) -> (i32, i32, i32) {
    %c0_i32 = arith.constant 0 : i32
    %c0_i32_0 = arith.constant 0 : i32
    %c0_i32_1 = arith.constant 0 : i32
    %c0_i32_2 = arith.constant 0 : i32
    return %c0_i32, %c0_i32_0, %c0_i32_1 : i32, i32, i32
  }
  func.func @transform_9(%arg0: i32) -> (i32, i32) {
    %c0_i32 = arith.constant 0 : i32
    %c0_i32_0 = arith.constant 0 : i32
    %c0_i32_1 = arith.constant 0 : i32
    return %c0_i32, %c0_i32_0 : i32, i32
  }
  func.func @transform_10(%arg0: i32) -> (i32, i32) {
    %c0_i32 = arith.constant 0 : i32
    %c0_i32_0 = arith.constant 0 : i32
    %c0_i32_1 = arith.constant 0 : i32
    return %c0_i32, %c0_i32_0 : i32, i32
  }
  func.func @transform_11(%arg0: i32) -> (i32, i32) {
    %c0_i32 = arith.constant 0 : i32
    %c0_i32_0 = arith.constant 0 : i32
    %c0_i32_1 = arith.constant 0 : i32
    return %c0_i32, %c0_i32_0 : i32, i32
  }
  func.func @transform_12(%arg0: i32) -> (i32, i32) {
    %c0_i32 = arith.constant 0 : i32
    %c0_i32_0 = arith.constant 0 : i32
    %c0_i32_1 = arith.constant 0 : i32
    return %c0_i32, %c0_i32_0 : i32, i32
  }
  func.func @transform_13(%arg0: i32) -> (i32, i32, i32) {
    %c0_i32 = arith.constant 0 : i32
    %c0_i32_0 = arith.constant 0 : i32
    %c0_i32_1 = arith.constant 0 : i32
    return %arg0, %c0_i32, %c0_i32_0 : i32, i32, i32
  }
}

</mosaic_0001>

<bundles_post_ra>
// kernel: tfam_forward.1
= control target key start
LH: loop header
LB: loop body
LE: loop exit
PB: predicated region body
PF: predicated region fallthrough
CT: control target
= control target key end

     0   :  { %v2724_v3 = vmov 0.0   ;;  %v2725_v4 = vmov 0   ;;  %vm67_vm0 = vcmask 523264   ;;  %vm142_vm5 = vcmask 1043456   ;;  %s4247_s0 = inlined_call_operand.vmem [shape: f32[2,64,256], index: 0, kind: input, shape index: {}]   ;;  %s4248_s2 = inlined_call_operand.vmem [shape: f32[4,1], index: 2, kind: input, shape index: {}]   ;;  %s4249_s7 = inlined_call_operand.vmem [shape: f32[256,196], index: 7, kind: input, shape index: {}]   ;;  %s4250_s1 = inlined_call_operand.vmem [shape: f32[4,64], index: 1, kind: input, shape index: {}]   ;;  %s4251_s5 = inlined_call_operand.vmem [shape: f32[4,256], index: 5, kind: input, shape index: {}]   ;;  %s4252_s9 = inlined_call_operand.vmem [shape: f32[196,256], index: 9, kind: input, shape index: {}]   ;;  %s4253_s3 = inlined_call_operand.vmem [shape: f32[4,4], index: 3, kind: input, shape index: {}]   ;;  %s4254_s6 = inlined_call_operand.vmem [shape: f32[4,196], index: 6, kind: input, shape index: {}]   ;;  %s4255_s8 = inlined_call_operand.vmem [shape: f32[8,4,196], index: 8, kind: input, shape index: {}]   ;;  %s4256_s10 = inlined_call_operand.vmem [shape: f32[4,1], index: 10, kind: input, shape index: {}]   ;;  %s4257_s12 = inlined_call_operand.vmem [shape: f32[64,1], index: 12, kind: input, shape index: {}]   ;;  %s4258_s4 = inlined_call_operand.vmem [shape: f32[4,1], index: 4, kind: input, shape index: {}]   ;;  %s4259_s11 = inlined_call_operand.vmem [shape: f32[64,4], index: 11, kind: input, shape index: {}]   ;;  %s4260_s13 = inlined_call_operand.vmem [shape: f32[2,64,256], index: 13, kind: output, shape index: {}]  }
   0x1   :  { %v45_v0 = vld [vmem:[%s4247_s0 + $0x8] sm:$0xff]  ;;  %v47_v1 = vld [vmem:[%s4247_s0 + $0x18] sm:$0xff]  ;;  %v44_v2 = vld [vmem:[%s4247_s0] sm:$0xff]  ;;  %135 = vmatprep.mubr.f32.mxu1 %v2724_v3  ;;  %2562 = vset.pattern.permute.xlu0 %v2725_v4  ;;  %vm2726_vm14 = vmmov 0   ;;  %vm151_vm15 = vcmask 31744  }
   0x2   :  { %v2303_v5 = vpack.c.bf16 %v47_v1, %v45_v0  ;;  %v46_v6 = vld [vmem:[%s4247_s0 + $0x10] sm:$0xff]  ;;  %v49_v7 = vld [vmem:[%s4247_s0 + $0x28] sm:$0xff]  ;;  %v51_v8 = vld [vmem:[%s4247_s0 + $0x38] sm:$0xff]  ;;  %2293 = vmatprep.subr.mxu0 %v2724_v3  ;;  %2563 = vset.pattern.permute.xlu1 %v2725_v4 }
   0x3   :  { %v2305_v9 = vpack.c.bf16 %v46_v6, %v44_v2  ;;  %v2307_v10 = vpack.c.bf16 %v51_v8, %v49_v7  ;;  %v48_v11 = vld [vmem:[%s4247_s0 + $0x20] sm:$0xff]  ;;  %v50_v12 = vld [vmem:[%s4247_s0 + $0x30] sm:$0xff]  ;;  %v53_v13 = vld [vmem:[%s4247_s0 + $0x48] sm:$0xff]  ;;  %2295 = vmatprep.mubr.msk.f32.mxu0 %vm2726_vm14, %v2724_v3 }
   0x4   :  { %2304 = vmatprep.subr.bf16.mxu1 %v2303_v5  ;;  %v55_v14 = vld [vmem:[%s4247_s0 + $0x58] sm:$0xff]  ;;  %v2309_v15 = vpack.c.bf16 %v50_v12, %v48_v11  ;;  %v52_v17 = vld [vmem:[%s4247_s0 + $0x40] sm:$0xff]  ;;  %v54_v18 = vld [vmem:[%s4247_s0 + $0x50] sm:$0xff] }
   0x5   :  { %2306 = vmatpush1.bf16.msra.mxu1 %v2305_v9  ;;  %v2311_v16 = vpack.c.bf16 %v55_v14, %v53_v13  ;;  %v57_v19 = vld [vmem:[%s4247_s0 + $0x68] sm:$0xff]  ;;  %v59_v20 = vld [vmem:[%s4247_s0 + $0x78] sm:$0xff]  ;;  %v61_v21 = vld [vmem:[%s4248_s2] sm:$0xf]  ;;  %v2313_v22 = vpack.c.bf16 %v54_v18, %v52_v17 }
   0x6   :  { %2308 = vmatprep.subr.bf16.mxu1 %v2307_v10  ;;  %64 = vperm.xlu0 %2562, %v61_v21   ;;  %v2315_v23 = vpack.c.bf16 %v59_v20, %v57_v19  ;;  %v56_v24 = vld [vmem:[%s4247_s0 + $0x60] sm:$0xff]  ;;  %v58_v25 = vld [vmem:[%s4247_s0 + $0x70] sm:$0xff]  ;;  %v236_v26 = vld [vmem:[%s4249_s7 + $0x8] sm:$0xff] }
   0x7   :  { %v238_v27 = vld [vmem:[%s4249_s7 + $0x18] sm:$0xff]  ;;  %v2317_v28 = vpack.c.bf16 %v58_v25, %v56_v24  ;;  %v235_v30 = vld [vmem:[%s4249_s7] sm:$0xff]  ;;  %v237_v31 = vld [vmem:[%s4249_s7 + $0x10] sm:$0xff] }
   0x8   :  { %v2319_v29 = vpack.c.bf16 %v238_v27, %v236_v26  ;;  %v240_v32 = vld [vmem:[%s4249_s7 + $0x28] sm:$0xff]  ;;  %v242_v33 = vld [vmem:[%s4249_s7 + $0x38] sm:$0xff]  ;;  %v60_v34 = vld [vmem:[%s4250_s1] sm:$0xf]  ;;  %v2321_v35 = vpack.c.bf16 %v237_v31, %v235_v30 }
   0x9   :  { %2310 = vmatpush1.bf16.msra.mxu1 %v2309_v15  ;;  %v2323_v36 = vpack.c.bf16 %v242_v33, %v240_v32  ;;  %v239_v37 = vld [vmem:[%s4249_s7 + $0x20] sm:$0xff]  ;;  %v241_v38 = vld [vmem:[%s4249_s7 + $0x30] sm:$0xff]  ;;  %v244_v39 = vld [vmem:[%s4249_s7 + $0x48] sm:$0xff] }
   0xa   :  { %2312 = vmatprep.subr.bf16.mxu1 %v2311_v16  ;;  %v246_v40 = vld [vmem:[%s4249_s7 + $0x58] sm:$0xff]  ;;  %v2325_v41 = vpack.c.bf16 %v241_v38, %v239_v37  ;;  %v243_v43 = vld [vmem:[%s4249_s7 + $0x40] sm:$0xff]  ;;  %v245_v44 = vld [vmem:[%s4249_s7 + $0x50] sm:$0xff] }
   0xb   :  { %v2327_v42 = vpack.c.bf16 %v246_v40, %v244_v39  ;;  %v248_v45 = vld [vmem:[%s4249_s7 + $0x68] sm:$0xff]  ;;  %v250_v46 = vld [vmem:[%s4249_s7 + $0x78] sm:$0xff]  ;;  %v2329_v47 = vpack.c.bf16 %v245_v44, %v243_v43  ;;  %v247_v49 = vld [vmem:[%s4249_s7 + $0x60] sm:$0xff] }
   0xc   :  { %v2331_v48 = vpack.c.bf16 %v250_v46, %v248_v45  ;;  %v249_v50 = vld [vmem:[%s4249_s7 + $0x70] sm:$0xff]  ;;  %v252_v51 = vld [vmem:[%s4249_s7 + $0x88] sm:$0xff]  ;;  %v254_v52 = vld [vmem:[%s4249_s7 + $0x98] sm:$0xff] }
   0xd   :  { %2314 = vmatpush1.bf16.msra.mxu1 %v2313_v22  ;;  %v2333_v53 = vpack.c.bf16 %v249_v50, %v247_v49  ;;  %v2335_v54 = vpack.c.bf16 %v254_v52, %v252_v51  ;;  %v251_v55 = vld [vmem:[%s4249_s7 + $0x80] sm:$0xff]  ;;  %v253_v56 = vld [vmem:[%s4249_s7 + $0x90] sm:$0xff]  ;;  %v256_v57 = vld [vmem:[%s4249_s7 + $0xa8] sm:$0xff] }
   0xe   :  { %2316 = vmatprep.subr.bf16.mxu1 %v2315_v23  ;;  %v258_v58 = vld [vmem:[%s4249_s7 + $0xb8] sm:$0xff]  ;;  %v2337_v59 = vpack.c.bf16 %v253_v56, %v251_v55  ;;  %v255_v61 = vld [vmem:[%s4249_s7 + $0xa0] sm:$0xff]  ;;  %v257_v62 = vld [vmem:[%s4249_s7 + $0xb0] sm:$0xff] }
   0xf   :  { %v2339_v60 = vpack.c.bf16 %v258_v58, %v256_v57  ;;  %v260_v63 = vld [vmem:[%s4249_s7 + $0xc8] sm:$0xff]  ;;  %v262_v0 = vld [vmem:[%s4249_s7 + $0xd8] sm:$0xff]  ;;  %v2341_v1 = vpack.c.bf16 %v257_v62, %v255_v61  ;;  %v259_v5 = vld [vmem:[%s4249_s7 + $0xc0] sm:$0xff] }
  0x10   :  { %v2343_v2 = vpack.c.bf16 %v262_v0, %v260_v63  ;;  %v261_v6 = vld [vmem:[%s4249_s7 + $0xd0] sm:$0xff]  ;;  %v264_v7 = vld [vmem:[%s4249_s7 + $0xe8] sm:$0xff]  ;;  %v266_v8 = vld [vmem:[%s4249_s7 + $0xf8] sm:$0xff] }
  0x11   :  { %2318 = vmatpush1.bf16.msra.mxu1 %v2317_v28  ;;  %v2345_v9 = vpack.c.bf16 %v261_v6, %v259_v5  ;;  %v2347_v10 = vpack.c.bf16 %v266_v8, %v264_v7  ;;  %v263_v11 = vld [vmem:[%s4249_s7 + $0xe0] sm:$0xff]  ;;  %v265_v12 = vld [vmem:[%s4249_s7 + $0xf0] sm:$0xff]  ;;  %v268_v13 = vld [vmem:[%s4249_s7 + $0x108] sm:$0xff] }
  0x12   :  { %2320 = vmatprep.subr.bf16.mxu1 %v2319_v29  ;;  %v270_v14 = vld [vmem:[%s4249_s7 + $0x118] sm:$0xff]  ;;  %v2349_v15 = vpack.c.bf16 %v265_v12, %v263_v11  ;;  %v267_v17 = vld [vmem:[%s4249_s7 + $0x100] sm:$0xff]  ;;  %v269_v18 = vld [vmem:[%s4249_s7 + $0x110] sm:$0xff] }
  0x13   :  { %v2351_v16 = vpack.c.bf16 %v270_v14, %v268_v13  ;;  %v272_v19 = vld [vmem:[%s4249_s7 + $0x128] sm:$0xff]  ;;  %v274_v20 = vld [vmem:[%s4249_s7 + $0x138] sm:$0xff]  ;;  %v2353_v21 = vpack.c.bf16 %v269_v18, %v267_v17  ;;  %v271_v23 = vld [vmem:[%s4249_s7 + $0x120] sm:$0xff] }
  0x14   :  { %2167 = vmatmul.mubr.msk.f32.vlgmr.msra.gmra.mrb[0].mxu1 %vm67_vm0, %v60_v34  ;;  %v2355_v22 = vpack.c.bf16 %v274_v20, %v272_v19  ;;  %v273_v24 = vld [vmem:[%s4249_s7 + $0x130] sm:$0xff]  ;;  %v276_v25 = vld [vmem:[%s4249_s7 + $0x148] sm:$0xff]  ;;  %v278_v26 = vld [vmem:[%s4249_s7 + $0x158] sm:$0xff] }
  0x15   :  { %2322 = vmatpush1.bf16.msra.mxu1 %v2321_v35  ;;  %v2357_v27 = vpack.c.bf16 %v273_v24, %v271_v23  ;;  %v2359_v28 = vpack.c.bf16 %v278_v26, %v276_v25  ;;  %v275_v29 = vld [vmem:[%s4249_s7 + $0x140] sm:$0xff]  ;;  %v277_v30 = vld [vmem:[%s4249_s7 + $0x150] sm:$0xff]  ;;  %v280_v31 = vld [vmem:[%s4249_s7 + $0x168] sm:$0xff] }
  0x16   :  { %2324 = vmatprep.subr.bf16.mxu1 %v2323_v36  ;;  %v282_v32 = vld [vmem:[%s4249_s7 + $0x178] sm:$0xff]  ;;  %v2361_v33 = vpack.c.bf16 %v277_v30, %v275_v29  ;;  %v279_v35 = vld [vmem:[%s4249_s7 + $0x160] sm:$0xff]  ;;  %v281_v36 = vld [vmem:[%s4249_s7 + $0x170] sm:$0xff] }
  0x17   :  { %v2363_v34 = vpack.c.bf16 %v282_v32, %v280_v31  ;;  %v284_v37 = vld [vmem:[%s4249_s7 + $0x188] sm:$0xff]  ;;  %v286_v38 = vld [vmem:[%s4249_s7 + $0x198] sm:$0xff]  ;;  %v2365_v39 = vpack.c.bf16 %v281_v36, %v279_v35  ;;  %v2170_v5 = vld [vmem:[%s4251_s5 + $0x1] ss:$4 sm:$0x3] }
  0x18   :  { %v2367_v40 = vpack.c.bf16 %v286_v38, %v284_v37  ;;  %v288_v43 = vld [vmem:[%s4249_s7 + $0x1a8] sm:$0xff]  ;;  %v290_v44 = vld [vmem:[%s4249_s7 + $0x1b8] sm:$0xff]  ;;  %v2172_v7 = vld [vmem:[%s4251_s5 + $0x2] ss:$4 sm:$0x3]  ;;  %vm406_vm2 = vcmp.gt.f32.partialorder %v2170_v5, 0.5 }
  0x19   :  { %2326 = vmatpush1.bf16.msra.mxu1 %v2325_v41  ;;  %v283_v41 = vld [vmem:[%s4249_s7 + $0x180] sm:$0xff]  ;;  %v2371_v46 = vpack.c.bf16 %v290_v44, %v288_v43  ;;  %v292_v49 = vld [vmem:[%s4249_s7 + $0x1c8] sm:$0xff]  ;;  %v294_v50 = vld [vmem:[%s4249_s7 + $0x1d8] sm:$0xff]  ;;  %vm444_vm3 = vcmp.gt.f32.partialorder %v2172_v7, 0.5  ;;  %v407_v11 = vsel %vm406_vm2, 1, %v2725_v4 }
  0x1a   :  { %2328 = vmatprep.subr.bf16.mxu1 %v2327_v42  ;;  %v285_v42 = vld [vmem:[%s4249_s7 + $0x190] sm:$0xff]  ;;  %v2375_v52 = vpack.c.bf16 %v294_v50, %v292_v49  ;;  %v296_v56 = vld [vmem:[%s4249_s7 + $0x1e8] sm:$0xff]  ;;  %v298_v57 = vld [vmem:[%s4249_s7 + $0x1f8] sm:$0xff]  ;;  %v445_v12 = vsel %vm444_vm3, 1, %v2725_v4 }
  0x1b   :  { %v2369_v45 = vpack.c.bf16 %v285_v42, %v283_v41  ;;  %v2379_v58 = vpack.c.bf16 %v298_v57, %v296_v56  ;;  %v2213_v62 = vld [vmem:[%s4247_s0 + $0x88] sm:$0xff]  ;;  %v2215_v63 = vld [vmem:[%s4247_s0 + $0x98] sm:$0xff]  ;;  %v2212_v19 = vld [vmem:[%s4247_s0 + $0x80] sm:$0xff] }
  0x1c   :  { %v2431_v0 = vpack.c.bf16 %v2215_v63, %v2213_v62  ;;  %v2214_v20 = vld [vmem:[%s4247_s0 + $0x90] sm:$0xff]  ;;  %v2217_v25 = vld [vmem:[%s4247_s0 + $0xa8] sm:$0xff]  ;;  %v2219_v26 = vld [vmem:[%s4247_s0 + $0xb8] sm:$0xff] }
  0x1d   :  { %2330 = vmatpush1.bf16.msra.mxu1 %v2329_v47  ;;  %v287_v47 = vld [vmem:[%s4249_s7 + $0x1a0] sm:$0xff]  ;;  %v2433_v30 = vpack.c.bf16 %v2214_v20, %v2212_v19  ;;  %v2218_v35 = vld [vmem:[%s4247_s0 + $0xb0] sm:$0xff]  ;;  %v2221_v36 = vld [vmem:[%s4247_s0 + $0xc8] sm:$0xff]  ;;  %v2435_v42 = vpack.c.bf16 %v2219_v26, %v2217_v25 }
  0x1e   :  { %2332 = vmatprep.subr.bf16.mxu1 %v2331_v48  ;;  %v289_v48 = vld [vmem:[%s4249_s7 + $0x1b0] sm:$0xff]  ;;  %v2223_v44 = vld [vmem:[%s4247_s0 + $0xd8] sm:$0xff]  ;;  %v2225_v62 = vld [vmem:[%s4247_s0 + $0xe8] sm:$0xff] }
  0x1f   :  { %v2373_v51 = vpack.c.bf16 %v289_v48, %v287_v47  ;;  %v2439_v57 = vpack.c.bf16 %v2223_v44, %v2221_v36  ;;  %v2227_v63 = vld [vmem:[%s4247_s0 + $0xf8] sm:$0xff]  ;;  %v1128_v20 = vld [vmem:[%s4250_s1] sm:$0xf]  ;;  %v646_v26 = vld [vmem:[%s4252_s9 + $0x10] sm:$0xff] }
  0x20   :  { %v647_v24 = vld [vmem:[%s4252_s9 + $0x18] sm:$0xff]  ;;  %v644_v25 = vld [vmem:[%s4252_s9] sm:$0xff]  ;;  %v650_v38 = vld [vmem:[%s4252_s9 + $0x30] sm:$0xff] }
  0x21   :  { %2334 = vmatpush1.bf16.msra.mxu1 %v2333_v53  ;;  %v291_v53 = vld [vmem:[%s4249_s7 + $0x1c0] sm:$0xff]  ;;  %v654_v44 = vld [vmem:[%s4252_s9 + $0x50] sm:$0xff] }
  0x22   :  { %2336 = vmatprep.subr.bf16.mxu1 %v2335_v54  ;;  %v293_v54 = vld [vmem:[%s4249_s7 + $0x1d0] sm:$0xff]  ;;  %v648_v37 = vld [vmem:[%s4252_s9 + $0x20] sm:$0xff] }
  0x23   :  { %v2377_v55 = vpack.c.bf16 %v293_v54, %v291_v53 }
  0x25   :  { %2338 = vmatpush1.bf16.msra.mxu1 %v2337_v59  ;;  %v295_v59 = vld [vmem:[%s4249_s7 + $0x1e0] sm:$0xff] }
  0x26   :  { %2340 = vmatprep.subr.bf16.mxu1 %v2339_v60  ;;  %v297_v60 = vld [vmem:[%s4249_s7 + $0x1f0] sm:$0xff] }
  0x27   :  { %v2381_v61 = vpack.c.bf16 %v297_v60, %v295_v59  ;;  %v2222_v59 = vld [vmem:[%s4247_s0 + $0xd0] sm:$0xff] }
  0x29   :  { %2342 = vmatpush1.bf16.msra.mxu1 %v2341_v1  ;;  %v373_v1 = vlaneseq }
  0x2a   :  { %2344 = vmatprep.subr.bf16.mxu1 %v2343_v2  ;;  %v370_v2 = vld [vmem:[%s4251_s5] ss:$4 sm:$0x3] }
  0x2b   :  { %v3060_v6 = vshrl.u32 %v373_v1, 7  ;;  %vm371_vm1 = vcmp.gt.f32.partialorder %v370_v2, 0.5 }
  0x2d   :  { %2346 = vmatpush1.bf16.msra.mxu1 %v2345_v9  ;;  %v3066_v8 = vsub.s32 0, %v3060_v6  ;;  %v372_v9 = vsel %vm371_vm1, 1, %v2725_v4  ;;  %vm702_vm1 = vcmask 556032  }
  0x2e   :  { %2348 = vmatprep.subr.bf16.mxu1 %v2347_v10  ;;  %v3070_v10 = vsub.s32 1, %v3060_v6 }
  0x2f   :  { %v376_v13 = vrot.slane %v372_v9, %v3066_v8  ;;  %v411_v14 = vrot.slane %v407_v11, %v3066_v8 }
  0x30   :  { %v415_v17 = vrot.slane %v407_v11, %v3070_v10  ;;  %v2443_v11 = vpack.c.bf16 %v2227_v63, %v2225_v62  ;;  %v666_v62 = vld [vmem:[%s4252_s9 + $0xb0] sm:$0xff]  ;;  %v669_v63 = vld [vmem:[%s4252_s9 + $0xc8] sm:$0xff] }
  0x31   :  { %2350 = vmatpush1.bf16.msra.mxu1 %v2349_v15  ;;  %v2174_v15 = vld [vmem:[%s4251_s5 + $0x3] ss:$4 sm:$0x3]  ;;  %vm3089_vm6 = vcmp.eq.s32.totalorder %v376_v13, 1  ;;  %vm3099_vm7 = vcmp.eq.s32.totalorder %v411_v14, 1  ;;  %v2226_v13 = vld [vmem:[%s4247_s0 + $0xf0] sm:$0xff] }
  0x32   :  { %2352 = vmatprep.subr.bf16.mxu1 %v2351_v16  ;;  %v380_v16 = vrot.slane %v372_v9, %v3070_v10  ;;  %vm482_vm4 = vcmp.gt.f32.partialorder %v2174_v15, 0.5  ;;  %vm3109_vm9 = vcmp.eq.s32.totalorder %v415_v17, 1 }
  0x34   :  { %vm3105_vm8 = vcmp.eq.s32.totalorder %v380_v16, 1 }
  0x35   :  { %2354 = vmatpush1.bf16.msra.mxu1 %v2353_v21  ;;  %v449_v21 = vrot.slane %v445_v12, %v3066_v8 }
  0x36   :  { %2356 = vmatprep.subr.bf16.mxu1 %v2355_v22  ;;  %v453_v22 = vrot.slane %v445_v12, %v3070_v10  ;;  %v2224_v12 = vld [vmem:[%s4247_s0 + $0xe0] sm:$0xff] }
  0x37   :  { %vm3124_vm10 = vcmp.eq.s32.totalorder %v449_v21, 1  ;;  %v2445_v17 = vpack.c.bf16 %v2226_v13, %v2224_v12  ;;  %v675_v12 = vld [vmem:[%s4252_s9 + $0xf8] sm:$0xff] }
  0x38   :  { %vm3128_vm11 = vcmp.eq.s32.totalorder %v453_v22, 1  ;;  %v1129_v22 = vld [vmem:[%s4248_s2] sm:$0xf] }
  0x39   :  { %2358 = vmatpush1.bf16.msra.mxu1 %v2357_v27  ;;  %v649_v27 = vld [vmem:[%s4252_s9 + $0x28] sm:$0xff] }
  0x3a   :  { %2360 = vmatprep.subr.bf16.mxu1 %v2359_v28 }
  0x3d   :  { %2362 = vmatpush1.bf16.msra.mxu1 %v2361_v33 }
  0x3e   :  { %2364 = vmatprep.subr.bf16.mxu1 %v2363_v34  ;;  %v2216_v34 = vld [vmem:[%s4247_s0 + $0xa0] sm:$0xff] }
  0x3f   :  { %v2437_v54 = vpack.c.bf16 %v2218_v35, %v2216_v34  ;;  %v149_v34 = vld [vmem:[%s4253_s3] sm:$0xf]  ;;  %v3237_v35 = vpack.c.bf16 %v646_v26, %v644_v25  ;;  %v683_v25 = vld [vmem:[%s4252_s9 + $0x138] sm:$0xff] }
  0x40   :  { %v2171_v26 = vld [vmem:[%s4254_s6 + $0x1] ss:$4 sm:$0x3] }
  0x41   :  { %2366 = vmatpush1.bf16.msra.mxu1 %v2365_v39  ;;  %v483_v39 = vsel %vm482_vm4, 1, %v2725_v4 }
  0x42   :  { %2368 = vmatprep.subr.bf16.mxu1 %v2367_v40 }
  0x45   :  { %2370 = vmatpush1.bf16.msra.mxu1 %v2369_v45 }
  0x46   :  { %2372 = vmatprep.subr.bf16.mxu1 %v2371_v46 }
  0x49   :  { %2374 = vmatpush1.bf16.msra.mxu1 %v2373_v51  ;;  %v487_v51 = vrot.slane %v483_v39, %v3066_v8 }
  0x4a   :  { %2376 = vmatprep.subr.bf16.mxu1 %v2375_v52  ;;  %v491_v52 = vrot.slane %v483_v39, %v3070_v10  ;;  %v653_v39 = vld [vmem:[%s4252_s9 + $0x48] sm:$0xff] }
  0x4b   :  { %vm3180_vm12 = vcmp.eq.s32.totalorder %v487_v51, 1  ;;  %v661_v51 = vld [vmem:[%s4252_s9 + $0x88] sm:$0xff] }
  0x4c   :  { %vm3184_vm13 = vcmp.eq.s32.totalorder %v491_v52, 1  ;;  %v663_v52 = vld [vmem:[%s4252_s9 + $0x98] sm:$0xff] }
  0x4d   :  { %2378 = vmatpush1.bf16.msra.mxu1 %v2377_v55 }
  0x4e   :  { %2380 = vmatprep.subr.bf16.mxu1 %v2379_v58  ;;  %v2220_v58 = vld [vmem:[%s4247_s0 + $0xc0] sm:$0xff] }
  0x4f   :  { %v2441_v5 = vpack.c.bf16 %v2222_v59, %v2220_v58  ;;  %v667_v58 = vld [vmem:[%s4252_s9 + $0xb8] sm:$0xff] }
  0x51   :  { %2382 = vmatpush1.bf16.msra.mxu1 %v2381_v61 }
  0x52   :  { %2432 = vmatprep.subr.bf16.mxu1 %v2431_v0  ;;  %v671_v0 = vld [vmem:[%s4252_s9 + $0xd8] sm:$0xff] }
  0x85   :  { %v65_v18 = vpop.permute.xlu0 %64 }
  0xe7   :  { %v137_v23 = vpop.f32.mrb[0].mxu1 }
  0xe8   :  { %v3103_v28 = vadd.f32 %v137_v23, %v65_v18  ;;  %v139_v29 = vpop.f32.mrb[1].mxu1  ;;  %v645_v23 = vld [vmem:[%s4252_s9 + $0x8] sm:$0xff] }
  0xe9   :  { %v3113_v33 = vadd.f32 %v139_v29, %v65_v18  ;;  %v651_v29 = vld [vmem:[%s4252_s9 + $0x38] sm:$0xff]  ;;  %v3232_v31 = vpack.c.bf16 %v647_v24, %v645_v23  ;;  %v678_v23 = vld [vmem:[%s4252_s9 + $0x110] sm:$0xff]  ;;  %v681_v24 = vld [vmem:[%s4252_s9 + $0x128] sm:$0xff] }
  0xea   :  { %v143_v40 = vsel %vm142_vm5, %v3103_v28, 0.0  ;;  %v383_v41 = vsel %vm3089_vm6, %v3103_v28, -1e+30  ;;  %v418_v43 = vsel %vm3099_vm7, %v3103_v28, -1e+30  ;;  %v3239_v36 = vpack.c.bf16 %v651_v29, %v649_v27 }
  0xeb   :  { %363 = vmatprep.mubr.f32.mxu1 %v3113_v33  ;;  %v144_v45 = vsel %vm142_vm5, %v3113_v33, 0.0  ;;  %v384_v46 = vsel %vm3105_vm8, %v3113_v33, -1e+30  ;;  %v385_v47 = vsel %vm142_vm5, %v383_v41, -inf  ;;  %v419_v48 = vsel %vm3109_vm9, %v3113_v33, -1e+30 }
  0xec   :  { %364 = vmatmul.mubr.f32.vlgmr.msra.gmra.mrb[2].mxu1 %v3103_v28  ;;  %v145_v49 = vadd.f32 %v144_v45, %v143_v40  ;;  %v386_v50 = vsel %vm142_vm5, %v384_v46, -inf  ;;  %v420_v55 = vsel %vm142_vm5, %v418_v43, -inf  ;;  %v421_v56 = vsel %vm142_vm5, %v419_v48, -inf  ;;  %v655_v40 = vld [vmem:[%s4252_s9 + $0x58] sm:$0xff]  ;;  %v652_v43 = vld [vmem:[%s4252_s9 + $0x40] sm:$0xff]  ;;  %v657_v45 = vld [vmem:[%s4252_s9 + $0x68] sm:$0xff] }
  0xed   :  { %2434 = vmatpush1.bf16.msra.mxu1 %v2433_v30  ;;  %v387_v53 = vmax.f32 %v385_v47, %v386_v50  ;;  %1202 = vmatprep.mubr.f32.mxu1 %v2724_v3  ;;  %v456_v60 = vsel %vm3124_vm10, %v3103_v28, -1e+30  ;;  %v457_v61 = vsel %vm3128_vm11, %v3113_v33, -1e+30  ;;  %v422_v2 = vmax.f32 %v420_v55, %v421_v56  ;;  %v659_v46 = vld [vmem:[%s4252_s9 + $0x78] sm:$0xff]  ;;  %v658_v50 = vld [vmem:[%s4252_s9 + $0x70] sm:$0xff] }
  0xee   :  { %146 = vadd.xlane.f32.xlu0 %v145_v49  ;;  %2436 = vmatprep.subr.bf16.mxu1 %v2435_v42  ;;  %v458_v7 = vsel %vm142_vm5, %v456_v60, -inf  ;;  %v459_v9 = vsel %vm142_vm5, %v457_v61, -inf  ;;  %v494_v14 = vsel %vm3180_vm12, %v3103_v28, -1e+30  ;;  %v495_v15 = vsel %vm3184_vm13, %v3113_v33, -1e+30 }
  0xef   :  { %388 = vmax.xlane.f32.xlu1 %v387_v53  ;;  %v460_v16 = vmax.f32 %v458_v7, %v459_v9  ;;  %v496_v18 = vsel %vm142_vm5, %v494_v14, -inf  ;;  %v497_v19 = vsel %vm142_vm5, %v495_v15, -inf  ;;  %v3257_v41 = vpack.c.bf16 %v650_v38, %v648_v37  ;;  %v656_v49 = vld [vmem:[%s4252_s9 + $0x60] sm:$0xff]  ;;  %v662_v56 = vld [vmem:[%s4252_s9 + $0x90] sm:$0xff] }
  0xf0   :  { %v498_v21 = vmax.f32 %v496_v18, %v497_v19  ;;  %v3260_v42 = vpack.c.bf16 %v655_v40, %v653_v39  ;;  %v3275_v47 = vpack.c.bf16 %v654_v44, %v652_v43  ;;  %v3278_v48 = vpack.c.bf16 %v659_v46, %v657_v45  ;;  %v660_v55 = vld [vmem:[%s4252_s9 + $0x80] sm:$0xff]  ;;  %v670_v7 = vld [vmem:[%s4252_s9 + $0xd0] sm:$0xff]  ;;  %v679_v18 = vld [vmem:[%s4252_s9 + $0x118] sm:$0xff] }
  0xf1   :  { %2438 = vmatpush1.bf16.msra.mxu1 %v2437_v54  ;;  %v3293_v53 = vpack.c.bf16 %v658_v50, %v656_v49  ;;  %v3296_v54 = vpack.c.bf16 %v663_v52, %v661_v51  ;;  %v3311_v59 = vpack.c.bf16 %v662_v56, %v660_v55  ;;  %v664_v61 = vld [vmem:[%s4252_s9 + $0xa0] sm:$0xff]  ;;  %v685_v39 = vld [vmem:[%s4252_s9 + $0x148] sm:$0xff]  ;;  %v687_v40 = vld [vmem:[%s4252_s9 + $0x158] sm:$0xff]  ;;  %v431_v43 = vrot.slane %v2171_v26, %v3066_v8 }
  0xf2   :  { %2440 = vmatprep.subr.bf16.mxu1 %v2439_v57  ;;  %v665_v57 = vld [vmem:[%s4252_s9 + $0xa8] sm:$0xff]  ;;  %v3329_v1 = vpack.c.bf16 %v666_v62, %v664_v61  ;;  %v672_v15 = vld [vmem:[%s4252_s9 + $0xe0] sm:$0xff]  ;;  %v435_v44 = vrot.slane %v2171_v26, %v3070_v10  ;;  %v2423_v56 = vpack.c.bf16 %v687_v40, %v685_v39  ;;  %v691_v61 = vld [vmem:[%s4252_s9 + $0x178] sm:$0xff] }
  0xf3   :  { %423 = vmax.xlane.f32.xlu1 %v422_v2  ;;  %v3314_v60 = vpack.c.bf16 %v667_v58, %v665_v57  ;;  %v2407_v2 = vpack.c.bf16 %v671_v0, %v669_v63  ;;  %v390_v29 = vld [vmem:[%s4254_s6] ss:$4 sm:$0x3]  ;;  %v2173_v37 = vld [vmem:[%s4254_s6 + $0x2] ss:$4 sm:$0x3] }
  0xf4   :  { %v395_v45 = vrot.slane %v390_v29, %v3066_v8  ;;  %v2175_v46 = vld [vmem:[%s4254_s6 + $0x3] ss:$4 sm:$0x3]  ;;  %v399_v51 = vrot.slane %v390_v29, %v3070_v10  ;;  %v469_v52 = vrot.slane %v2173_v37, %v3066_v8  ;;  %v473_v55 = vrot.slane %v2173_v37, %v3070_v10  ;;  %v686_v57 = vld [vmem:[%s4252_s9 + $0x150] sm:$0xff]  ;;  %v689_v58 = vld [vmem:[%s4252_s9 + $0x168] sm:$0xff] }
  0xf5   :  { %2442 = vmatpush1.bf16.msra.mxu1 %v2441_v5  ;;  %v668_v5 = vld [vmem:[%s4252_s9 + $0xc0] sm:$0xff]  ;;  %v507_v0 = vrot.slane %v2175_v46, %v3066_v8  ;;  %v3432_v37 = vsub.s32 2, %v3060_v6 }
  0xf6   :  { %2444 = vmatprep.subr.bf16.mxu1 %v2443_v11  ;;  %v673_v11 = vld [vmem:[%s4252_s9 + $0xe8] sm:$0xff]  ;;  %v2409_v13 = vpack.c.bf16 %v670_v7, %v668_v5  ;;  %v684_v50 = vld [vmem:[%s4252_s9 + $0x140] sm:$0xff] }
  0xf7   :  { %461 = vmax.xlane.f32.xlu1 %v460_v16  ;;  %v2411_v14 = vpack.c.bf16 %v675_v12, %v673_v11  ;;  %v674_v16 = vld [vmem:[%s4252_s9 + $0xf0] sm:$0xff]  ;;  %v2425_v7 = vpack.c.bf16 %v686_v57, %v684_v50  ;;  %v2427_v11 = vpack.c.bf16 %v691_v61, %v689_v58  ;;  %v3437_v40 = vld [vmem:[%s4255_s8] sm:$0xff] }
  0xf9   :  { %2446 = vmatpush1.bf16.msra.mxu1 %v2445_v17  ;;  %v677_v17 = vld [vmem:[%s4252_s9 + $0x108] sm:$0xff] }
  0xfa   :  { %2298 = vmatprep.subr.mxu1 %v2724_v3 }
  0xfb   :  { %499 = vmax.xlane.f32.xlu1 %v498_v21  ;;  %v2415_v21 = vpack.c.bf16 %v679_v18, %v677_v17  ;;  %v690_v17 = vld [vmem:[%s4252_s9 + $0x170] sm:$0xff] }
  0xfc   :  { %2228 = vmatmul.mubr.msk.f32.vlgmr.msra.gmra.mrb[4].mxu1 %vm67_vm0, %v1128_v20  ;;  %v2413_v20 = vpack.c.bf16 %v674_v16, %v672_v15  ;;  %v688_v16 = vld [vmem:[%s4252_s9 + $0x160] sm:$0xff] }
  0xfd   :  { %2300 = vmatprep.mubr.msk.f32.mxu1 %vm2726_vm14, %v2724_v3 }
 0x104   :  { %1132 = vperm.xlu0 %2562, %v1129_v22   ;;  %v676_v22 = vld [vmem:[%s4252_s9 + $0x100] sm:$0xff] }
 0x105   :  { %v2417_v27 = vpack.c.bf16 %v678_v23, %v676_v22  ;;  %v2429_v22 = vpack.c.bf16 %v690_v17, %v688_v16  ;;  %v2179_v17 = vld [vmem:[%s4255_s8 + $0x20] sm:$0xff] }
 0x17b   :  { %v147_v30 = vpop.xlane.xlu0 %146 }
 0x17c   :  { %v148_v32 = vmul.f32 0.00390625, %v147_v30  ;;  %v389_v9 = vpop.xlane.xlu1 %388  ;;  %v2419_v30 = vpack.c.bf16 %v683_v25, %v681_v24 }
 0x17d   :  { %v402_v12 = vmul.f32 %v395_v45, %v389_v9 }
 0x17e   :  { %2294 = vmatpush3.msk.msra.mxu0 %vm142_vm5, %v148_v32  ;;  %v680_v32 = vld [vmem:[%s4252_s9 + $0x120] sm:$0xff] }
 0x17f   :  { %2296 = vmatmul.mubr.msk.f32.vlgmr.msra.gmra.mrb[0].mxu0 %vm151_vm15, %v149_v34  ;;  %2384 = vmatprep.subr.bf16.mxu0 %v3232_v31  ;;  %v682_v34 = vld [vmem:[%s4252_s9 + $0x130] sm:$0xff] }
 0x180   :  { %2386 = vmatpush1.bf16.msra.mxu0 %v3237_v35  ;;  %v424_v19 = vpop.xlane.xlu1 %423  ;;  %v2421_v49 = vpack.c.bf16 %v682_v34, %v680_v32 }
 0x181   :  { %2388 = vmatprep.subr.bf16.mxu0 %v3239_v36  ;;  %v438_v62 = vmul.f32 %v431_v43, %v424_v19  ;;  %v439_v63 = vmul.f32 %v435_v44, %v424_v19  ;;  %v3442_v43 = vld [vmem:[%s4255_s8 + $0x8] sm:$0xff] }
 0x183   :  { %v440_v18 = vadd.f32 %v438_v62, %v402_v12 }
 0x184   :  { %2390 = vmatpush1.bf16.msra.mxu0 %v3257_v41  ;;  %v462_v38 = vpop.xlane.xlu1 %461 }
 0x185   :  { %2392 = vmatprep.subr.bf16.mxu0 %v3260_v42  ;;  %v477_v15 = vmul.f32 %v473_v55, %v462_v38 }
 0x188   :  { %2394 = vmatpush1.bf16.msra.mxu0 %v3275_v47  ;;  %v500_v5 = vpop.xlane.xlu1 %499 }
 0x189   :  { %2396 = vmatprep.subr.bf16.mxu0 %v3278_v48 }
 0x18c   :  { %2398 = vmatpush1.bf16.msra.mxu0 %v3293_v53 }
 0x18d   :  { %2400 = vmatprep.subr.bf16.mxu0 %v3296_v54 }
 0x190   :  { %2402 = vmatpush1.bf16.msra.mxu0 %v3311_v59 }
 0x191   :  { %2404 = vmatprep.subr.bf16.mxu0 %v3314_v60 }
 0x194   :  { %2406 = vmatpush1.bf16.msra.mxu0 %v3329_v1 }
 0x195   :  { %2408 = vmatprep.subr.bf16.mxu0 %v2407_v2  ;;  %v511_v2 = vrot.slane %v2175_v46, %v3070_v10  ;;  %v3447_v46 = vsub.s32 3, %v3060_v6 }
 0x198   :  { %2410 = vmatpush1.bf16.msra.mxu0 %v2409_v13  ;;  %v403_v13 = vmul.f32 %v399_v51, %v389_v9  ;;  %v693_v9 = vld [vmem:[%s4252_s9 + $0x188] sm:$0xf] }
 0x199   :  { %2412 = vmatprep.subr.bf16.mxu0 %v2411_v14  ;;  %v476_v14 = vmul.f32 %v469_v52, %v462_v38  ;;  %v3454_v52 = vld [vmem:[%s4255_s8 + $0x10] sm:$0xff] }
 0x19a   :  { %v441_v19 = vadd.f32 %v439_v63, %v403_v13  ;;  %v2178_v63 = vld [vmem:[%s4255_s8 + $0x18] sm:$0xff] }
 0x19b   :  { %v478_v23 = vadd.f32 %v476_v14, %v440_v18  ;;  %v1435_v18 = vld [vmem:[%s4251_s5] ss:$4 sm:$0x3] }
 0x19c   :  { %2414 = vmatpush1.bf16.msra.mxu0 %v2413_v20  ;;  %v514_v20 = vmul.f32 %v507_v0, %v500_v5  ;;  %v479_v24 = vadd.f32 %v477_v15, %v441_v19  ;;  %vm1436_vm0 = vcmp.gt.f32.partialorder %v1435_v18, 0.5  ;;  %v2231_v18 = vld [vmem:[%s4251_s5 + $0x1] ss:$4 sm:$0x3] }
 0x19d   :  { %2416 = vmatprep.subr.bf16.mxu0 %v2415_v21  ;;  %v515_v21 = vmul.f32 %v511_v2, %v500_v5  ;;  %vm1470_vm4 = vcmp.gt.f32.partialorder %v2231_v18, 0.5 }
 0x19e   :  { %v516_v25 = vadd.f32 %v514_v20, %v478_v23  ;;  %v2180_v23 = vld [vmem:[%s4255_s8 + $0x28] sm:$0xff] }
 0x19f   :  { %v517_v26 = vadd.f32 %v515_v21, %v479_v24 }
 0x1a0   :  { %2418 = vmatpush1.bf16.msra.mxu0 %v2417_v27  ;;  %v692_v27 = vld [vmem:[%s4252_s9 + $0x180] sm:$0xf]  ;;  %v522_v29 = vrot.slane %v516_v25, %v3066_v8  ;;  %v537_v32 = vrot.slane %v516_v25, %v3070_v10  ;;  %v553_v44 = vrot.slane %v516_v25, %v3432_v37  ;;  %v569_v55 = vrot.slane %v516_v25, %v3447_v46  ;;  %v2181_v25 = vld [vmem:[%s4255_s8 + $0x30] sm:$0xff] }
 0x1a1   :  { %2420 = vmatprep.subr.bf16.mxu0 %v2419_v30  ;;  %v526_v30 = vrot.slane %v517_v26, %v3066_v8  ;;  %v541_v34 = vrot.slane %v517_v26, %v3070_v10  ;;  %v557_v45 = vrot.slane %v517_v26, %v3432_v37 }
 0x1a3   :  { %v529_v38 = vcombine.low %v522_v29, %v526_v30  ;;  %v544_v39 = vcombine.low %v537_v32, %v541_v34  ;;  %v560_v51 = vcombine.low %v553_v44, %v557_v45  ;;  %v2182_v29 = vld [vmem:[%s4255_s8 + $0x38] sm:$0xff]  ;;  %v1437_v30 = vsel %vm1436_vm0, 1, %v2725_v4 }
 0x1a4   :  { %2422 = vmatpush1.bf16.msra.mxu0 %v2421_v49  ;;  %v1441_v44 = vrot.slane %v1437_v30, %v3066_v8  ;;  %v1445_v45 = vrot.slane %v1437_v30, %v3070_v10 }
 0x1a5   :  { %2424 = vmatprep.subr.bf16.mxu0 %v2423_v56  ;;  %v531_v49 = vmul.f32 %v529_v38, %v3437_v40  ;;  %v546_v50 = vmul.f32 %v3442_v43, %v544_v39  ;;  %v573_v56 = vrot.slane %v517_v26, %v3447_v46  ;;  %v562_v58 = vmul.f32 %v3454_v52, %v560_v51 }
 0x1a6   :  { %vm1446_vm2 = vcmp.eq.s32.totalorder %v1441_v44, 1  ;;  %vm1447_vm3 = vcmp.eq.s32.totalorder %v1445_v45, 1 }
 0x1a7   :  { %v547_v57 = vadd.f32 %v546_v50, %v531_v49  ;;  %v576_v61 = vcombine.low %v569_v55, %v573_v56  ;;  %v1133_v50 = vpop.permute.xlu0 %1132 }
 0x1a8   :  { %2426 = vmatpush1.bf16.msra.mxu0 %v2425_v7 }
 0x1a9   :  { %2428 = vmatprep.subr.bf16.mxu0 %v2427_v11  ;;  %v563_v62 = vadd.f32 %v562_v58, %v547_v57  ;;  %v578_v16 = vmul.f32 %v2178_v63, %v576_v61 }
 0x1ab   :  { %v579_v24 = vadd.f32 %v578_v16, %v563_v62 }
 0x1ac   :  { %2430 = vmatpush1.bf16.msra.mxu0 %v2429_v22 }
 0x1ad   :  { %2183 = vmatprep.subr.msk.mxu0 %vm142_vm5, %v693_v9 }
 0x1b0   :  { %2184 = vmatpush1.msk.msra.mxu0 %vm142_vm5, %v692_v27 }
 0x1bf   :  { %v365_v6 = vpop.f32.mrb[2].mxu1 }
 0x1c0   :  { %v585_v0 = vrot.slane %v365_v6, %v3066_v8  ;;  %v601_v2 = vrot.slane %v365_v6, %v3070_v10  ;;  %v617_v5 = vrot.slane %v365_v6, %v3432_v37  ;;  %v633_v7 = vrot.slane %v365_v6, %v3447_v46  ;;  %v367_v11 = vpop.f32.mrb[3].mxu1 }
 0x1c1   :  { %v589_v12 = vrot.slane %v367_v11, %v3066_v8  ;;  %v605_v13 = vrot.slane %v367_v11, %v3070_v10  ;;  %v621_v14 = vrot.slane %v367_v11, %v3432_v37  ;;  %v637_v15 = vrot.slane %v367_v11, %v3447_v46  ;;  %v798_v11 = vld [vmem:[%s4257_s12 + $0x30] sm:$0xff] }
 0x1c3   :  { %v592_v19 = vcombine.low %v585_v0, %v589_v12  ;;  %v608_v20 = vcombine.low %v601_v2, %v605_v13  ;;  %v624_v21 = vcombine.low %v617_v5, %v621_v14  ;;  %v640_v22 = vcombine.low %v633_v7, %v637_v15  ;;  %v1746_v2 = vld [vmem:[%s4256_s10] sm:$0xf]  ;;  %v794_v5 = vld [vmem:[%s4257_s12 + $0x10] sm:$0xff] }
 0x1c4   :  { %v796_v7 = vld [vmem:[%s4257_s12 + $0x20] sm:$0xff] }
 0x1c5   :  { %v594_v9 = vmul.f32 %v2179_v17, %v592_v19  ;;  %v610_v27 = vmul.f32 %v2180_v23, %v608_v20  ;;  %v626_v34 = vmul.f32 %v2181_v25, %v624_v21  ;;  %v642_v38 = vmul.f32 %v2182_v29, %v640_v22  ;;  %v3513_v12 = vld [vmem:[%s4257_s12] sm:$0xff] }
 0x1c6   :  { %v150_v13 = vld [vmem:[%s4258_s4] sm:$0xf]  ;;  %v1471_v20 = vsel %vm1470_vm4, 1, %v2725_v4 }
 0x1c7   :  { %v595_v26 = vadd.f32 %v594_v9, %v579_v24  ;;  %v694_v17 = vld [vmem:[%s4256_s10] sm:$0xf]  ;;  %v1475_v22 = vrot.slane %v1471_v20, %v3066_v8  ;;  %v1479_v23 = vrot.slane %v1471_v20, %v3070_v10  ;;  %v1302_v20 = vld [vmem:[%s4249_s7 + $0x10] sm:$0xff] }
 0x1c8   :  { %v2233_v19 = vld [vmem:[%s4251_s5 + $0x2] ss:$4 sm:$0x3]  ;;  %v2235_v21 = vld [vmem:[%s4251_s5 + $0x3] ss:$4 sm:$0x3] }
 0x1c9   :  { %v611_v32 = vadd.f32 %v610_v27, %v595_v26  ;;  %vm1506_vm6 = vcmp.gt.f32.partialorder %v2233_v19, 0.5  ;;  %vm1542_vm7 = vcmp.gt.f32.partialorder %v2235_v21, 0.5  ;;  %vm1480_vm8 = vcmp.eq.s32.totalorder %v1475_v22, 1  ;;  %v1300_v19 = vld [vmem:[%s4249_s7] sm:$0xff]  ;;  %v1305_v21 = vld [vmem:[%s4249_s7 + $0x28] sm:$0xff] }
 0x1ca   :  { %v1507_v24 = vsel %vm1506_vm6, 1, %v2725_v4  ;;  %vm1481_vm9 = vcmp.eq.s32.totalorder %v1479_v23, 1  ;;  %v1543_v26 = vsel %vm1542_vm7, 1, %v2725_v4 }
 0x1cb   :  { %v627_v39 = vadd.f32 %v626_v34, %v611_v32  ;;  %v1511_v9 = vrot.slane %v1507_v24, %v3066_v8  ;;  %v1515_v25 = vrot.slane %v1507_v24, %v3070_v10  ;;  %v1547_v34 = vrot.slane %v1543_v26, %v3066_v8  ;;  %v3579_v24 = vld [vmem:[%s4259_s11] sm:$0xff] }
 0x1cd   :  { %v643_v49 = vadd.f32 %v642_v38, %v627_v39  ;;  %vm1516_vm10 = vcmp.eq.s32.totalorder %v1511_v9, 1  ;;  %vm1517_vm11 = vcmp.eq.s32.totalorder %v1515_v25, 1  ;;  %v1551_v38 = vrot.slane %v1543_v26, %v3070_v10  ;;  %v1304_v26 = vld [vmem:[%s4249_s7 + $0x20] sm:$0xff] }
 0x1ce   :  { %vm1552_vm12 = vcmp.eq.s32.totalorder %v1547_v34, 1  ;;  %v2449_v9 = vpack.c.bf16 %v1302_v20, %v1300_v19  ;;  %v1327_v19 = vld [vmem:[%s4249_s7 + $0xd8] sm:$0xff]  ;;  %v3681_v20 = vld [vmem:[%s4259_s11 + $0x28] sm:$0xff] }
 0x1cf   :  { %v1204_v51 = vpop.f32.mrb[4].mxu1  ;;  %v701_v55 = vcombine.high %v643_v49, %v643_v49  ;;  %vm1553_vm13 = vcmp.eq.s32.totalorder %v1551_v38, 1 }
 0x1d0   :  { %v3488_v56 = vadd.f32 %v1204_v51, %v1133_v50  ;;  %v1206_v57 = vpop.f32.mrb[5].mxu1 }
 0x1d1   :  { %v3490_v58 = vadd.f32 %v1206_v57, %v1133_v50  ;;  %2185 = vmatprep.mubr.msk.f32.mxu0 %vm702_vm1, %v701_v55 }
 0x1d2   :  { %776 = vmatmul.mubr.f32.vlgmr.msra.gmra.mrb[2].mxu0 %v643_v49  ;;  %v1448_v61 = vsel %vm1446_vm2, %v3488_v56, -1e+30  ;;  %v1209_v27 = vsel %vm142_vm5, %v3488_v56, 0.0  ;;  %v1482_v30 = vsel %vm1480_vm8, %v3488_v56, -1e+30 }
 0x1d3   :  { %v1449_v6 = vsel %vm1447_vm3, %v3490_v58, -1e+30  ;;  %v1450_v62 = vsel %vm142_vm5, %v1448_v61, -inf  ;;  %934 = vmatprep.mubr.f32.mxu0 %v2724_v3  ;;  %v1210_v29 = vsel %vm142_vm5, %v3490_v58, 0.0  ;;  %v1483_v32 = vsel %vm1481_vm9, %v3490_v58, -1e+30 }
 0x1d4   :  { %v1451_v63 = vsel %vm142_vm5, %v1449_v6, -inf  ;;  %v1211_v39 = vadd.f32 %v1210_v29, %v1209_v27  ;;  %v1484_v44 = vsel %vm142_vm5, %v1482_v30, -inf  ;;  %v1485_v4 = vsel %vm142_vm5, %v1483_v32, -inf  ;;  %v1306_v27 = vld [vmem:[%s4249_s7 + $0x30] sm:$0xff]  ;;  %v1309_v29 = vld [vmem:[%s4249_s7 + $0x48] sm:$0xff]  ;;  %v1311_v30 = vld [vmem:[%s4249_s7 + $0x58] sm:$0xff] }
 0x1d5   :  { %v1452_v0 = vmax.f32 %v1450_v62, %v1451_v63  ;;  %v1518_v45 = vsel %vm1516_vm10, %v3488_v56, -1e+30  ;;  %v1519_v49 = vsel %vm1517_vm11, %v3490_v58, -1e+30  ;;  %v1486_v50 = vmax.f32 %v1484_v44, %v1485_v4  ;;  %v3601_v32 = vld [vmem:[%s4259_s11 + $0x8] sm:$0xff]  ;;  %v1310_v44 = vld [vmem:[%s4249_s7 + $0x50] sm:$0xff] }
 0x1d6   :  { %v1520_v51 = vsel %vm142_vm5, %v1518_v45, -inf  ;;  %v1521_v55 = vsel %vm142_vm5, %v1519_v49, -inf  ;;  %v1554_v57 = vsel %vm1552_vm12, %v3488_v56, -1e+30  ;;  %v1555_v61 = vsel %vm1553_vm13, %v3490_v58, -1e+30 }
 0x1d7   :  { %1453 = vmax.xlane.f32.xlu0 %v1452_v0  ;;  %v1522_v6 = vmax.f32 %v1520_v51, %v1521_v55  ;;  %v1556_v62 = vsel %vm142_vm5, %v1554_v57, -inf  ;;  %v1557_v63 = vsel %vm142_vm5, %v1555_v61, -inf  ;;  %v2453_v34 = vpack.c.bf16 %v1306_v27, %v1304_v26  ;;  %v1313_v4 = vld [vmem:[%s4249_s7 + $0x68] sm:$0xff]  ;;  %v1315_v45 = vld [vmem:[%s4249_s7 + $0x78] sm:$0xff]  ;;  %v3621_v49 = vld [vmem:[%s4259_s11 + $0x10] sm:$0xff] }
 0x1d8   :  { %v1558_v0 = vmax.f32 %v1556_v62, %v1557_v63  ;;  %v2455_v38 = vpack.c.bf16 %v1311_v30, %v1309_v29  ;;  %v2459_v51 = vpack.c.bf16 %v1315_v45, %v1313_v4  ;;  %v1312_v55 = vld [vmem:[%s4249_s7 + $0x60] sm:$0xff]  ;;  %v1314_v57 = vld [vmem:[%s4249_s7 + $0x70] sm:$0xff]  ;;  %v1317_v61 = vld [vmem:[%s4249_s7 + $0x88] sm:$0xff] }
 0x1d9   :  { %v3641_v62 = vld [vmem:[%s4259_s11 + $0x18] sm:$0xff]  ;;  %v2461_v63 = vpack.c.bf16 %v1314_v57, %v1312_v55  ;;  %v1328_v29 = vld [vmem:[%s4249_s7 + $0xe0] sm:$0xff]  ;;  %v1330_v30 = vld [vmem:[%s4249_s7 + $0xf0] sm:$0xff] }
 0x1da   :  { %v1332_v45 = vld [vmem:[%s4249_s7 + $0x100] sm:$0xff]  ;;  %v1339_v55 = vld [vmem:[%s4249_s7 + $0x138] sm:$0xff] }
 0x1ed   :  { %1749 = vperm.xlu0 %2562, %v1746_v2  }
 0x1f1   :  { %812 = vperm.xlu0 %2562, %v794_v5  }
 0x1f5   :  { %822 = vperm.xlu0 %2562, %v796_v7  }
 0x1f9   :  { %832 = vperm.xlu0 %2562, %v798_v11  }
 0x1fd   :  { %1853 = vperm.xlu0 %2562, %v3513_v12  }
 0x201   :  { %1863 = vperm.xlu0 %2562, %v794_v5  }
 0x205   :  { %1873 = vperm.xlu0 %2562, %v796_v7  }
 0x209   :  { %1883 = vperm.xlu0 %2562, %v798_v11  }
 0x252   :  { %v224_v14 = vpop.f32.mrb[0].mxu0 }
 0x253   :  { %v225_v15 = vadd.f32 %v224_v14, %v150_v13  ;;  %v2297_v16 = vpop.f32.mrb[1].mxu0  ;;  %v1301_v13 = vld [vmem:[%s4249_s7 + $0x8] sm:$0xff]  ;;  %v1303_v14 = vld [vmem:[%s4249_s7 + $0x18] sm:$0xff] }
 0x254   :  { %v2447_v23 = vpack.c.bf16 %v1303_v14, %v1301_v13  ;;  %v3661_v13 = vld [vmem:[%s4259_s11 + $0x20] sm:$0xff] }
 0x255   :  { %230 = vperm.xlu1 %2563, %v225_v15  }
 0x259   :  { %697 = vperm.xlu1 %2563, %v694_v17  }
 0x27d   :  { %1212 = vadd.xlane.f32.xlu1 %v1211_v39  ;;  %v1308_v39 = vld [vmem:[%s4249_s7 + $0x40] sm:$0xff] }
 0x281   :  { %1487 = vmax.xlane.f32.xlu1 %v1486_v50  ;;  %v2457_v50 = vpack.c.bf16 %v1310_v44, %v1308_v39  ;;  %v3721_v39 = vld [vmem:[%s4259_s11 + $0x38] sm:$0xff]  ;;  %v2477_v44 = vpack.c.bf16 %v1330_v30, %v1328_v29  ;;  %v1353_v29 = vld [vmem:[%s4249_s7 + $0x1a8] sm:$0xff] }
 0x282   :  { %v1355_v30 = vld [vmem:[%s4249_s7 + $0x1b8] sm:$0xff] }
 0x285   :  { %1523 = vmax.xlane.f32.xlu1 %v1522_v6  ;;  %v1319_v6 = vld [vmem:[%s4249_s7 + $0x98] sm:$0xff] }
 0x289   :  { %1559 = vmax.xlane.f32.xlu1 %v1558_v0  ;;  %v2463_v0 = vpack.c.bf16 %v1319_v6, %v1317_v61  ;;  %v1336_v6 = vld [vmem:[%s4249_s7 + $0x120] sm:$0xff] }
 0x2a5   :  { %v777_v2 = vpop.f32.mrb[2].mxu0 }
 0x2a6   :  { %v779_v5 = vpop.f32.mrb[3].mxu0 }
 0x2d4   :  { %v231_v7 = vpop.permute.xlu1 %230 }
 0x2d5   :  { %v233_v15 = vmul.f32 %v231_v7, %v3103_v28  ;;  %v234_v16 = vmul.f32 %v231_v7, %v3113_v33  ;;  %v1307_v28 = vld [vmem:[%s4249_s7 + $0x38] sm:$0xff]  ;;  %v1321_v7 = vld [vmem:[%s4249_s7 + $0xa8] sm:$0xff] }
 0x2d6   :  { %v2451_v25 = vpack.c.bf16 %v1307_v28, %v1305_v21 }
 0x2d8   :  { %v698_v11 = vpop.permute.xlu1 %697 }
 0x2d9   :  { %v778_v17 = vadd.f32 %v777_v2, %v698_v11  ;;  %v780_v18 = vadd.f32 %v779_v5, %v698_v11  ;;  %v1316_v2 = vld [vmem:[%s4249_s7 + $0x80] sm:$0xff]  ;;  %v1318_v5 = vld [vmem:[%s4249_s7 + $0x90] sm:$0xff]  ;;  %v1323_v11 = vld [vmem:[%s4249_s7 + $0xb8] sm:$0xff] }
 0x2da   :  { %v2465_v14 = vpack.c.bf16 %v1318_v5, %v1316_v2  ;;  %v1343_v2 = vld [vmem:[%s4249_s7 + $0x158] sm:$0xff] }
 0x2db   :  { %v790_v22 = vadd.f32 %v778_v17, %v233_v15  ;;  %v791_v33 = vadd.f32 %v780_v18, %v234_v16  ;;  %v2467_v15 = vpack.c.bf16 %v1323_v11, %v1321_v7  ;;  %v1320_v16 = vld [vmem:[%s4249_s7 + $0xa0] sm:$0xff]  ;;  %v1322_v17 = vld [vmem:[%s4249_s7 + $0xb0] sm:$0xff]  ;;  %v1325_v18 = vld [vmem:[%s4249_s7 + $0xc8] sm:$0xff] }
 0x2dc   :  { %v2469_v21 = vpack.c.bf16 %v1322_v17, %v1320_v16  ;;  %v2471_v28 = vpack.c.bf16 %v1327_v19, %v1325_v18  ;;  %v1340_v11 = vld [vmem:[%s4249_s7 + $0x140] sm:$0xff]  ;;  %v1347_v16 = vld [vmem:[%s4249_s7 + $0x178] sm:$0xff] }
 0x2dd   :  { %2186 = vmatprep.subr.msk.mxu0 %vm142_vm5, %v791_v33  ;;  %v1326_v33 = vld [vmem:[%s4249_s7 + $0xd0] sm:$0xff]  ;;  %v1344_v19 = vld [vmem:[%s4249_s7 + $0x160] sm:$0xff] }
 0x2de   :  { %2187 = vmatpush1.msk.msra.mxu0 %vm142_vm5, %v790_v22  ;;  %v1324_v22 = vld [vmem:[%s4249_s7 + $0xc0] sm:$0xff] }
 0x2df   :  { %2188 = vmatmul.mubr.msk.f32.vlgmr.msra.gmra.mrb[4].mxu0 %vm151_vm15, %v3579_v24  ;;  %2448 = vmatprep.subr.bf16.mxu0 %v2447_v23  ;;  %v1329_v23 = vld [vmem:[%s4249_s7 + $0xe8] sm:$0xff]  ;;  %v2473_v26 = vpack.c.bf16 %v1326_v33, %v1324_v22  ;;  %v1351_v22 = vld [vmem:[%s4249_s7 + $0x198] sm:$0xff] }
 0x2e0   :  { %2450 = vmatpush1.bf16.msra.mxu0 %v2449_v9  ;;  %940 = vmatprep.mubr.f32.mxu0 %v2724_v3  ;;  %v1331_v9 = vld [vmem:[%s4249_s7 + $0xf8] sm:$0xff] }
 0x2e1   :  { %2452 = vmatprep.subr.bf16.mxu0 %v2451_v25  ;;  %v3701_v25 = vld [vmem:[%s4259_s11 + $0x30] sm:$0xff]  ;;  %v2475_v27 = vpack.c.bf16 %v1331_v9, %v1329_v23  ;;  %v1348_v9 = vld [vmem:[%s4249_s7 + $0x180] sm:$0xff] }
 0x2e3   :  { %2189 = vmatmul.mubr.msk.f32.gmra.mrb[6].mxu0 %vm151_vm15, %v3601_v32 }
 0x2e4   :  { %2454 = vmatpush1.bf16.msra.mxu0 %v2453_v34  ;;  %946 = vmatprep.mubr.f32.mxu0 %v2724_v3  ;;  %v1333_v34 = vld [vmem:[%s4249_s7 + $0x108] sm:$0xff] }
 0x2e5   :  { %2456 = vmatprep.subr.bf16.mxu0 %v2455_v38  ;;  %v1335_v38 = vld [vmem:[%s4249_s7 + $0x118] sm:$0xff] }
 0x2e6   :  { %v2479_v4 = vpack.c.bf16 %v1335_v38, %v1333_v34  ;;  %v1215_v34 = vld [vmem:[%s4253_s3] sm:$0xf] }
 0x2e7   :  { %2190 = vmatmul.mubr.msk.f32.gmra.mrb[8].mxu0 %vm151_vm15, %v3621_v49 }
 0x2e8   :  { %2458 = vmatpush1.bf16.msra.mxu0 %v2457_v50  ;;  %952 = vmatprep.mubr.f32.mxu0 %v2724_v3  ;;  %v1334_v50 = vld [vmem:[%s4249_s7 + $0x110] sm:$0xff] }
 0x2e9   :  { %2460 = vmatprep.subr.bf16.mxu0 %v2459_v51  ;;  %v1337_v51 = vld [vmem:[%s4249_s7 + $0x128] sm:$0xff]  ;;  %v2481_v57 = vpack.c.bf16 %v1334_v50, %v1332_v45  ;;  %v1352_v45 = vld [vmem:[%s4249_s7 + $0x1a0] sm:$0xff]  ;;  %v1354_v50 = vld [vmem:[%s4249_s7 + $0x1b0] sm:$0xff] }
 0x2ea   :  { %v2483_v61 = vpack.c.bf16 %v1339_v55, %v1337_v51  ;;  %v1357_v51 = vld [vmem:[%s4249_s7 + $0x1c8] sm:$0xff]  ;;  %v1359_v55 = vld [vmem:[%s4249_s7 + $0x1d8] sm:$0xff] }
 0x2eb   :  { %2191 = vmatmul.mubr.msk.f32.gmra.mrb[10].mxu0 %vm151_vm15, %v3641_v62 }
 0x2ec   :  { %2462 = vmatpush1.bf16.msra.mxu0 %v2461_v63  ;;  %958 = vmatprep.mubr.f32.mxu0 %v2724_v3  ;;  %v1338_v63 = vld [vmem:[%s4249_s7 + $0x130] sm:$0xff] }
 0x2ed   :  { %2464 = vmatprep.subr.bf16.mxu0 %v2463_v0  ;;  %v1341_v0 = vld [vmem:[%s4249_s7 + $0x148] sm:$0xff]  ;;  %v2485_v5 = vpack.c.bf16 %v1338_v63, %v1336_v6  ;;  %v1356_v6 = vld [vmem:[%s4249_s7 + $0x1c0] sm:$0xff]  ;;  %v1358_v63 = vld [vmem:[%s4249_s7 + $0x1d0] sm:$0xff] }
 0x2ee   :  { %v2487_v7 = vpack.c.bf16 %v1343_v2, %v1341_v0  ;;  %v1360_v2 = vld [vmem:[%s4249_s7 + $0x1e0] sm:$0xff] }
 0x2ef   :  { %2192 = vmatmul.mubr.msk.f32.gmra.mrb[12].mxu0 %vm151_vm15, %v3661_v13 }
 0x2f0   :  { %2466 = vmatpush1.bf16.msra.mxu0 %v2465_v14  ;;  %964 = vmatprep.mubr.f32.mxu0 %v2724_v3  ;;  %v1342_v14 = vld [vmem:[%s4249_s7 + $0x150] sm:$0xff] }
 0x2f1   :  { %2468 = vmatprep.subr.bf16.mxu0 %v2467_v15  ;;  %v1345_v15 = vld [vmem:[%s4249_s7 + $0x168] sm:$0xff]  ;;  %v2489_v17 = vpack.c.bf16 %v1342_v14, %v1340_v11  ;;  %v1726_v14 = vld [vmem:[%s4252_s9 + $0xf0] sm:$0xff] }
 0x2f2   :  { %v2491_v18 = vpack.c.bf16 %v1347_v16, %v1345_v15  ;;  %v1729_v16 = vld [vmem:[%s4252_s9 + $0x108] sm:$0xff] }
 0x2f3   :  { %2193 = vmatmul.mubr.msk.f32.gmra.mrb[14].mxu0 %vm151_vm15, %v3681_v20 }
 0x2f4   :  { %2470 = vmatpush1.bf16.msra.mxu0 %v2469_v21  ;;  %970 = vmatprep.mubr.f32.mxu0 %v2724_v3  ;;  %v1346_v21 = vld [vmem:[%s4249_s7 + $0x170] sm:$0xff] }
 0x2f5   :  { %2472 = vmatprep.subr.bf16.mxu0 %v2471_v28  ;;  %v1349_v28 = vld [vmem:[%s4249_s7 + $0x188] sm:$0xff]  ;;  %v2493_v33 = vpack.c.bf16 %v1346_v21, %v1344_v19  ;;  %v1728_v19 = vld [vmem:[%s4252_s9 + $0x100] sm:$0xff]  ;;  %v1730_v21 = vld [vmem:[%s4252_s9 + $0x110] sm:$0xff] }
 0x2f6   :  { %v2495_v23 = vpack.c.bf16 %v1351_v22, %v1349_v28  ;;  %v2545_v28 = vpack.c.bf16 %v1730_v21, %v1728_v19  ;;  %v1733_v22 = vld [vmem:[%s4252_s9 + $0x128] sm:$0xff] }
 0x2f7   :  { %2194 = vmatmul.mubr.msk.f32.gmra.mrb[16].mxu0 %vm151_vm15, %v3701_v25 }
 0x2f8   :  { %2474 = vmatpush1.bf16.msra.mxu0 %v2473_v26  ;;  %976 = vmatprep.mubr.f32.mxu0 %v2724_v3  ;;  %v1350_v26 = vld [vmem:[%s4249_s7 + $0x190] sm:$0xff] }
 0x2f9   :  { %2476 = vmatprep.subr.bf16.mxu0 %v2475_v27 }
 0x2fb   :  { %2195 = vmatmul.mubr.msk.f32.gmra.mrb[18].mxu0 %vm151_vm15, %v3721_v39 }
 0x2fc   :  { %2478 = vmatpush1.bf16.msra.mxu0 %v2477_v44  ;;  %1428 = vmatprep.mubr.f32.mxu0 %v3490_v58  ;;  %v2497_v44 = vpack.c.bf16 %v1350_v26, %v1348_v9  ;;  %v1732_v9 = vld [vmem:[%s4252_s9 + $0x120] sm:$0xff]  ;;  %v1734_v26 = vld [vmem:[%s4252_s9 + $0x130] sm:$0xff] }
 0x2fd   :  { %2480 = vmatprep.subr.bf16.mxu0 %v2479_v4  ;;  %v2499_v4 = vpack.c.bf16 %v1355_v30, %v1353_v29  ;;  %v1737_v29 = vld [vmem:[%s4252_s9 + $0x148] sm:$0xff]  ;;  %v1739_v30 = vld [vmem:[%s4252_s9 + $0x158] sm:$0xff] }
 0x300   :  { %2482 = vmatpush1.bf16.msra.mxu0 %v2481_v57  ;;  %v2501_v57 = vpack.c.bf16 %v1354_v50, %v1352_v45  ;;  %v1743_v45 = vld [vmem:[%s4252_s9 + $0x178] sm:$0xff] }
 0x301   :  { %2484 = vmatprep.subr.bf16.mxu0 %v2483_v61  ;;  %v2503_v61 = vpack.c.bf16 %v1359_v55, %v1357_v51  ;;  %v1740_v55 = vld [vmem:[%s4252_s9 + $0x160] sm:$0xff] }
 0x304   :  { %2486 = vmatpush1.bf16.msra.mxu0 %v2485_v5  ;;  %v1362_v5 = vld [vmem:[%s4249_s7 + $0x1f0] sm:$0xff] }
 0x305   :  { %2488 = vmatprep.subr.bf16.mxu0 %v2487_v7  ;;  %v2509_v7 = vpack.c.bf16 %v1362_v5, %v1360_v2 }
 0x308   :  { %2490 = vmatpush1.bf16.msra.mxu0 %v2489_v17  ;;  %v1731_v17 = vld [vmem:[%s4252_s9 + $0x118] sm:$0xff] }
 0x309   :  { %2492 = vmatprep.subr.bf16.mxu0 %v2491_v18  ;;  %v2543_v18 = vpack.c.bf16 %v1731_v17, %v1729_v16 }
 0x30a   :  { %v1213_v27 = vpop.xlane.xlu1 %1212 }
 0x30b   :  { %v1214_v38 = vmul.f32 0.00390625, %v1213_v27  ;;  %v2549_v27 = vpack.c.bf16 %v1734_v26, %v1732_v9 }
 0x30c   :  { %2494 = vmatpush1.bf16.msra.mxu0 %v2493_v33  ;;  %v1735_v33 = vld [vmem:[%s4252_s9 + $0x138] sm:$0xff] }
 0x30d   :  { %2299 = vmatpush3.msk.msra.mxu1 %vm142_vm5, %v1214_v38  ;;  %2496 = vmatprep.subr.bf16.mxu0 %v2495_v23  ;;  %v2547_v23 = vpack.c.bf16 %v1735_v33, %v1733_v22  ;;  %v2551_v38 = vpack.c.bf16 %v1739_v30, %v1737_v29 }
 0x30e   :  { %2301 = vmatmul.mubr.msk.f32.vlgmr.msra.gmra.mrb[6].mxu1 %vm151_vm15, %v1215_v34  ;;  %2512 = vmatprep.subr.bf16.mxu1 %v3232_v31  ;;  %v1361_v31 = vld [vmem:[%s4249_s7 + $0x1e8] sm:$0xff]  ;;  %v1736_v34 = vld [vmem:[%s4252_s9 + $0x140] sm:$0xff] }
 0x30f   :  { %2514 = vmatpush1.bf16.msra.mxu1 %v3237_v35  ;;  %v1363_v35 = vld [vmem:[%s4249_s7 + $0x1f8] sm:$0xff] }
 0x310   :  { %2498 = vmatpush1.bf16.msra.mxu0 %v2497_v44  ;;  %2516 = vmatprep.subr.bf16.mxu1 %v3239_v36  ;;  %v2505_v36 = vpack.c.bf16 %v1358_v63, %v1356_v6  ;;  %v2507_v0 = vpack.c.bf16 %v1363_v35, %v1361_v31  ;;  %v1738_v44 = vld [vmem:[%s4252_s9 + $0x150] sm:$0xff]  ;;  %v1745_v6 = vld [vmem:[%s4252_s9 + $0x188] sm:$0xf]  ;;  %v1744_v63 = vld [vmem:[%s4252_s9 + $0x180] sm:$0xf]  ;;  %v3915_v31 = vpop.xlane.xlu0 %1453 }
 0x311   :  { %2500 = vmatprep.subr.bf16.mxu0 %v2499_v4  ;;  %v1741_v4 = vld [vmem:[%s4252_s9 + $0x168] sm:$0xff]  ;;  %v2553_v50 = vpack.c.bf16 %v1738_v44, %v1736_v34  ;;  %v2232_v44 = vld [vmem:[%s4254_s6 + $0x1] ss:$4 sm:$0x3] }
 0x312   :  { %v2555_v51 = vpack.c.bf16 %v1743_v45, %v1741_v4 }
 0x313   :  { %2518 = vmatpush1.bf16.msra.mxu1 %v3257_v41  ;;  %v1721_v41 = vld [vmem:[%s4252_s9 + $0xc8] sm:$0xff] }
 0x314   :  { %2502 = vmatpush1.bf16.msra.mxu0 %v2501_v57  ;;  %2520 = vmatprep.subr.bf16.mxu1 %v3260_v42  ;;  %v1723_v42 = vld [vmem:[%s4252_s9 + $0xd8] sm:$0xff]  ;;  %v1742_v57 = vld [vmem:[%s4252_s9 + $0x170] sm:$0xff] }
 0x315   :  { %2504 = vmatprep.subr.bf16.mxu0 %v2503_v61  ;;  %v2557_v61 = vpack.c.bf16 %v1742_v57, %v1740_v55  ;;  %v2234_v55 = vld [vmem:[%s4254_s6 + $0x2] ss:$4 sm:$0x3] }
 0x317   :  { %2522 = vmatpush1.bf16.msra.mxu1 %v3275_v47  ;;  %v1720_v47 = vld [vmem:[%s4252_s9 + $0xc0] sm:$0xff] }
 0x318   :  { %2506 = vmatpush1.bf16.msra.mxu0 %v2505_v36  ;;  %2524 = vmatprep.subr.bf16.mxu1 %v3278_v48  ;;  %v2535_v48 = vpack.c.bf16 %v1723_v42, %v1721_v41 }
 0x319   :  { %2508 = vmatprep.subr.bf16.mxu0 %v2507_v0  ;;  %v3921_v0 = vpop.permute.xlu0 %1749 }
 0x31b   :  { %2526 = vmatpush1.bf16.msra.mxu1 %v3293_v53  ;;  %v1722_v53 = vld [vmem:[%s4252_s9 + $0xd0] sm:$0xff] }
 0x31c   :  { %2510 = vmatpush1.bf16.msra.mxu0 %v2509_v7  ;;  %2528 = vmatprep.subr.bf16.mxu1 %v3296_v54  ;;  %v2537_v54 = vpack.c.bf16 %v1722_v53, %v1720_v47 }
 0x31d   :  { %v813_v7 = vpop.permute.xlu0 %812 }
 0x31f   :  { %1429 = vmatmul.mubr.f32.vlgmr.msra.gmra.mrb[20].mxu0 %v3488_v56  ;;  %2530 = vmatpush1.bf16.msra.mxu1 %v3311_v59  ;;  %v1725_v59 = vld [vmem:[%s4252_s9 + $0xe8] sm:$0xff] }
 0x320   :  { %2532 = vmatprep.subr.bf16.mxu1 %v3314_v60  ;;  %1985 = vmatprep.mubr.f32.mxu0 %v2724_v3  ;;  %v1727_v60 = vld [vmem:[%s4252_s9 + $0xf8] sm:$0xff] }
 0x321   :  { %v2539_v11 = vpack.c.bf16 %v1727_v60, %v1725_v59 }
 0x323   :  { %2534 = vmatpush1.bf16.msra.mxu1 %v3329_v1  ;;  %v1724_v1 = vld [vmem:[%s4252_s9 + $0xe0] sm:$0xff] }
 0x324   :  { %2536 = vmatprep.subr.bf16.mxu1 %v2535_v48  ;;  %v2541_v15 = vpack.c.bf16 %v1726_v14, %v1724_v1  ;;  %v823_v1 = vpop.permute.xlu0 %822 }
 0x327   :  { %2538 = vmatpush1.bf16.msra.mxu1 %v2537_v54 }
 0x328   :  { %2540 = vmatprep.subr.bf16.mxu1 %v2539_v11  ;;  %v833_v22 = vpop.permute.xlu0 %832 }
 0x32b   :  { %2542 = vmatpush1.bf16.msra.mxu1 %v2541_v15 }
 0x32c   :  { %2544 = vmatprep.subr.bf16.mxu1 %v2543_v18 }
 0x32f   :  { %2546 = vmatpush1.bf16.msra.mxu1 %v2545_v28 }
 0x330   :  { %2548 = vmatprep.subr.bf16.mxu1 %v2547_v23  ;;  %v1488_v23 = vpop.xlane.xlu1 %1487 }
 0x333   :  { %2550 = vmatpush1.bf16.msra.mxu1 %v2549_v27 }
 0x334   :  { %2552 = vmatprep.subr.bf16.mxu1 %v2551_v38  ;;  %v1524_v57 = vpop.xlane.xlu1 %1523 }
 0x337   :  { %2554 = vmatpush1.bf16.msra.mxu1 %v2553_v50 }
 0x338   :  { %2556 = vmatprep.subr.bf16.mxu1 %v2555_v51  ;;  %v1455_v51 = vld [vmem:[%s4254_s6] ss:$4 sm:$0x3] }
 0x33b   :  { %2558 = vmatpush1.bf16.msra.mxu1 %v2557_v61 }
 0x33c   :  { %2244 = vmatprep.subr.msk.mxu1 %vm142_vm5, %v1745_v6  ;;  %v1494_v6 = vrot.slane %v2232_v44, %v3066_v8 }
 0x33f   :  { %2245 = vmatpush1.msk.msra.mxu1 %vm142_vm5, %v1744_v63 }
 0x3b2   :  { %v3917_v35 = vpop.f32.mrb[4].mxu0 }
 0x3b3   :  { %v3919_v36 = vpop.f32.mrb[5].mxu0 }
 0x3b6   :  { %v3923_v2 = vpop.f32.mrb[6].mxu0 }
 0x3b7   :  { %v3925_v5 = vpop.f32.mrb[7].mxu0 }
 0x3ba   :  { %v948_v41 = vpop.f32.mrb[8].mxu0 }
 0x3bb   :  { %v949_v42 = vadd.f32 %v948_v41, %v813_v7  ;;  %v950_v47 = vpop.f32.mrb[9].mxu0  ;;  %v2236_v41 = vld [vmem:[%s4254_s6 + $0x3] ss:$4 sm:$0x3] }
 0x3bc   :  { %v951_v48 = vadd.f32 %v950_v47, %v813_v7  ;;  %v1498_v7 = vrot.slane %v2232_v44, %v3070_v10  ;;  %v1460_v47 = vrot.slane %v1455_v51, %v3066_v8 }
 0x3bd   :  { %v2200_v53 = vmul.f32 -1.442695, %v949_v42 }
 0x3be   :  { %v2201_v54 = vmul.f32 -1.442695, %v951_v48  ;;  %v3927_v59 = vpop.f32.mrb[10].mxu0  ;;  %v1530_v48 = vrot.slane %v2234_v55, %v3066_v8 }
 0x3bf   :  { %2564 = vpow2.f32 %v2200_v53  ;;  %v3929_v60 = vpop.f32.mrb[11].mxu0 }
 0x3c0   :  { %2566 = vpow2.f32 %v2201_v54  ;;  %v1464_v54 = vrot.slane %v1455_v51, %v3070_v10 }
 0x3c2   :  { %v960_v11 = vpop.f32.mrb[12].mxu0 }
 0x3c3   :  { %v961_v14 = vadd.f32 %v960_v11, %v823_v1  ;;  %v962_v15 = vpop.f32.mrb[13].mxu0  ;;  %v1501_v11 = vmul.f32 %v1494_v6, %v1488_v23 }
 0x3c4   :  { %v963_v16 = vadd.f32 %v962_v15, %v823_v1  ;;  %v1534_v1 = vrot.slane %v2234_v55, %v3070_v10 }
 0x3c5   :  { %v2204_v17 = vmul.f32 -1.442695, %v961_v14  ;;  %v1566_v14 = vrot.slane %v2236_v41, %v3066_v8 }
 0x3c6   :  { %v2205_v18 = vmul.f32 -1.442695, %v963_v16  ;;  %v3931_v19 = vpop.f32.mrb[14].mxu0  ;;  %v1502_v16 = vmul.f32 %v1498_v7, %v1488_v23 }
 0x3c7   :  { %2568 = vpow2.f32 %v2204_v17  ;;  %v3933_v21 = vpop.f32.mrb[15].mxu0  ;;  %v1570_v17 = vrot.slane %v2236_v41, %v3070_v10 }
 0x3c8   :  { %2570 = vpow2.f32 %v2205_v18  ;;  %v1560_v18 = vpop.xlane.xlu1 %1559 }
 0x3c9   :  { %v2565_v28 = vpop.eup %2564  ;;  %v1573_v44 = vmul.f32 %v1566_v14, %v1560_v18  ;;  %v1574_v55 = vmul.f32 %v1570_v17, %v1560_v18 }
 0x3ca   :  { %v2567_v33 = vpop.eup %2566  ;;  %v1035_v9 = vadd.f32 1.0, %v2565_v28  ;;  %v972_v26 = vpop.f32.mrb[16].mxu0 }
 0x3cb   :  { %v1036_v27 = vadd.f32 1.0, %v2567_v33  ;;  %v973_v29 = vadd.f32 %v972_v26, %v833_v22  ;;  %v974_v30 = vpop.f32.mrb[17].mxu0  ;;  %v1537_v33 = vmul.f32 %v1530_v48, %v1524_v57 }
 0x3cc   :  { %2572 = vrcp.f32 %v1035_v9  ;;  %v975_v34 = vadd.f32 %v974_v30, %v833_v22  ;;  %v1467_v22 = vmul.f32 %v1460_v47, %v3915_v31  ;;  %v2692_v9 = vld [vmem:[%s4247_s0 + $0x20] sm:$0xff]  ;;  %v2693_v30 = vld [vmem:[%s4247_s0 + $0x28] sm:$0xff] }
 0x3cd   :  { %2574 = vrcp.f32 %v1036_v27  ;;  %v2208_v38 = vmul.f32 -1.442695, %v973_v29  ;;  %v1468_v27 = vmul.f32 %v1464_v54, %v3915_v31  ;;  %v1538_v29 = vmul.f32 %v1534_v1, %v1524_v57  ;;  %v2694_v47 = vld [vmem:[%s4247_s0 + $0x40] sm:$0xff]  ;;  %v2695_v54 = vld [vmem:[%s4247_s0 + $0x48] sm:$0xff] }
 0x3ce   :  { %v2209_v4 = vmul.f32 -1.442695, %v975_v34  ;;  %v3938_v45 = vpop.f32.mrb[18].mxu0 }
 0x3cf   :  { %2576 = vpow2.f32 %v2208_v38  ;;  %v3940_v50 = vpop.f32.mrb[19].mxu0  ;;  %v1503_v38 = vadd.f32 %v1501_v11, %v1467_v22  ;;  %v1504_v51 = vadd.f32 %v1502_v16, %v1468_v27  ;;  %v2696_v27 = vld [vmem:[%s4247_s0 + $0x60] sm:$0xff] }
 0x3d0   :  { %2578 = vpow2.f32 %v2209_v4 }
 0x3d1   :  { %v2569_v61 = vpop.eup %2568  ;;  %v1539_v57 = vadd.f32 %v1537_v33, %v1503_v38  ;;  %v1540_v6 = vadd.f32 %v1538_v29, %v1504_v51 }
 0x3d2   :  { %v2571_v63 = vpop.eup %2570  ;;  %v1039_v42 = vadd.f32 1.0, %v2569_v61 }
 0x3d3   :  { %v1040_v53 = vadd.f32 1.0, %v2571_v63  ;;  %v1575_v63 = vadd.f32 %v1573_v44, %v1539_v57  ;;  %v1576_v41 = vadd.f32 %v1574_v55, %v1540_v6  ;;  %v793_v44 = vld [vmem:[%s4257_s12 + $0x8] sm:$0xff]  ;;  %v795_v57 = vld [vmem:[%s4257_s12 + $0x18] sm:$0xff] }
 0x3d4   :  { %2580 = vrcp.f32 %v1039_v42 }
 0x3d5   :  { %2582 = vrcp.f32 %v1040_v53  ;;  %v1216_v53 = vld [vmem:[%s4258_s4] sm:$0xf]  ;;  %v1581_v11 = vrot.slane %v1575_v63, %v3066_v8  ;;  %v1595_v16 = vrot.slane %v1575_v63, %v3070_v10  ;;  %v1599_v17 = vrot.slane %v1576_v41, %v3070_v10 }
 0x3d6   :  { %v2573_v15 = vpop.eup %2572 }
 0x3d7   :  { %v2575_v28 = vpop.eup %2574  ;;  %v1083_v26 = vmul.f32 %v2692_v9, %v2573_v15  ;;  %v1585_v15 = vrot.slane %v1576_v41, %v3066_v8  ;;  %v1602_v9 = vcombine.low %v1595_v16, %v1599_v17  ;;  %v2240_v16 = vld [vmem:[%s4255_s8 + $0x20] sm:$0xff]  ;;  %v799_v17 = vld [vmem:[%s4257_s12 + $0x38] sm:$0xff] }
 0x3d8   :  { %v1084_v23 = vmul.f32 %v2693_v30, %v2575_v28  ;;  %v1610_v30 = vrot.slane %v1575_v63, %v3432_v37 }
 0x3d9   :  { %v2577_v34 = vpop.eup %2576  ;;  %1099 = vst [vmem:[%s4260_s13 + $0x20] sm:$0xff] %v1083_v26  ;;  %v1588_v33 = vcombine.low %v1581_v11, %v1585_v15  ;;  %v1604_v51 = vmul.f32 %v3442_v43, %v1602_v9  ;;  %v797_v43 = vld [vmem:[%s4257_s12 + $0x28] sm:$0xff] }
 0x3da   :  { %v2579_v4 = vpop.eup %2578  ;;  %1100 = vst [vmem:[%s4260_s13 + $0x28] sm:$0xff] %v1084_v23  ;;  %v1043_v31 = vadd.f32 1.0, %v2577_v34  ;;  %v1614_v23 = vrot.slane %v1576_v41, %v3432_v37  ;;  %v2697_v34 = vld [vmem:[%s4247_s0 + $0x68] sm:$0xff] }
 0x3db   :  { %v1044_v61 = vadd.f32 1.0, %v2579_v4  ;;  %v1590_v4 = vmul.f32 %v1588_v33, %v3437_v40  ;;  %v2242_v33 = vld [vmem:[%s4255_s8 + $0x30] sm:$0xff] }
 0x3dc   :  { %2584 = vrcp.f32 %v1043_v31  ;;  %v1617_v55 = vcombine.low %v1610_v30, %v1614_v23  ;;  %v1629_v31 = vrot.slane %v1576_v41, %v3447_v46 }
 0x3dd   :  { %2586 = vrcp.f32 %v1044_v61  ;;  %v1605_v61 = vadd.f32 %v1604_v51, %v1590_v4 }
 0x3de   :  { %v2581_v7 = vpop.eup %2580  ;;  %v1619_v6 = vmul.f32 %v3454_v52, %v1617_v55 }
 0x3df   :  { %v2583_v42 = vpop.eup %2582  ;;  %v1087_v48 = vmul.f32 %v2694_v47, %v2581_v7 }
 0x3e0   :  { %v1088_v1 = vmul.f32 %v2695_v54, %v2583_v42  ;;  %v1620_v42 = vadd.f32 %v1619_v6, %v1605_v61 }
 0x3e1   :  { %1103 = vst [vmem:[%s4260_s13 + $0x40] sm:$0xff] %v1087_v48  ;;  %v1289_v14 = vpop.f32.mrb[6].mxu1 }
 0x3e2   :  { %1104 = vst [vmem:[%s4260_s13 + $0x48] sm:$0xff] %v1088_v1  ;;  %v1290_v18 = vadd.f32 %v1289_v14, %v1216_v53  ;;  %v2302_v28 = vpop.f32.mrb[7].mxu1 }
 0x3e4   :  { %1295 = vperm.xlu1 %2563, %v1290_v18  }
 0x3e6   :  { %v2585_v22 = vpop.eup %2584 }
 0x3e7   :  { %v2587_v26 = vpop.eup %2586  ;;  %v1091_v29 = vmul.f32 %v2696_v27, %v2585_v22  ;;  %v2243_v27 = vld [vmem:[%s4255_s8 + $0x38] sm:$0xff] }
 0x3e8   :  { %v1092_v38 = vmul.f32 %v2697_v34, %v2587_v26  ;;  %802 = vperm.xlu1 %2563, %v3513_v12   ;;  %v1625_v12 = vrot.slane %v1575_v63, %v3447_v46  ;;  %v2239_v63 = vld [vmem:[%s4255_s8 + $0x18] sm:$0xff] }
 0x3e9   :  { %1107 = vst [vmem:[%s4260_s13 + $0x60] sm:$0xff] %v1091_v29 }
 0x3ea   :  { %1108 = vst [vmem:[%s4260_s13 + $0x68] sm:$0xff] %v1092_v38  ;;  %v1632_v40 = vcombine.low %v1625_v12, %v1629_v31 }
 0x3ec   :  { %807 = vperm.xlu1 %2563, %v793_v44   ;;  %v1634_v15 = vmul.f32 %v2239_v63, %v1632_v40 }
 0x3f0   :  { %817 = vperm.xlu1 %2563, %v795_v57  }
 0x3f2   :  { %v1430_v7 = vpop.f32.mrb[20].mxu0 }
 0x3f3   :  { %v1640_v41 = vrot.slane %v1430_v7, %v3066_v8  ;;  %v1655_v47 = vrot.slane %v1430_v7, %v3070_v10  ;;  %v1670_v48 = vrot.slane %v1430_v7, %v3432_v37  ;;  %v1685_v52 = vrot.slane %v1430_v7, %v3447_v46  ;;  %v1432_v53 = vpop.f32.mrb[21].mxu0 }
 0x3f4   :  { %v1644_v54 = vrot.slane %v1432_v53, %v3066_v8  ;;  %v1659_v1 = vrot.slane %v1432_v53, %v3070_v10  ;;  %v1674_v11 = vrot.slane %v1432_v53, %v3432_v37  ;;  %v1689_v14 = vrot.slane %v1432_v53, %v3447_v46  ;;  %827 = vperm.xlu1 %2563, %v797_v43   ;;  %v2241_v10 = vld [vmem:[%s4255_s8 + $0x28] sm:$0xff] }
 0x3f5   :  { %v1635_v37 = vadd.f32 %v1634_v15, %v1620_v42 }
 0x3f6   :  { %v1647_v18 = vcombine.low %v1640_v41, %v1644_v54  ;;  %v1662_v28 = vcombine.low %v1655_v47, %v1659_v1  ;;  %v1677_v22 = vcombine.low %v1670_v48, %v1674_v11  ;;  %v1692_v8 = vcombine.low %v1685_v52, %v1689_v14 }
 0x3f8   :  { %v1649_v46 = vmul.f32 %v2240_v16, %v1647_v18  ;;  %837 = vperm.xlu1 %2563, %v799_v17   ;;  %v1664_v26 = vmul.f32 %v2241_v10, %v1662_v28  ;;  %v1679_v30 = vmul.f32 %v2242_v33, %v1677_v22  ;;  %v1694_v23 = vmul.f32 %v2243_v27, %v1692_v8  ;;  %v2698_v33 = vld [vmem:[%s4247_s0] sm:$0xff]  ;;  %v2699_v27 = vld [vmem:[%s4247_s0 + $0x8] sm:$0xff] }
 0x3fa   :  { %v1650_v9 = vadd.f32 %v1649_v46, %v1635_v37 }
 0x3fc   :  { %v1665_v29 = vadd.f32 %v1664_v26, %v1650_v9  ;;  %1858 = vperm.xlu1 %2563, %v793_v44  }
 0x3fe   :  { %v1680_v34 = vadd.f32 %v1679_v30, %v1665_v29 }
 0x400   :  { %1868 = vperm.xlu1 %2563, %v795_v57   ;;  %v1695_v38 = vadd.f32 %v1694_v23, %v1680_v34 }
 0x402   :  { %v1753_v4 = vcombine.high %v1695_v38, %v1695_v38 }
 0x404   :  { %1878 = vperm.xlu1 %2563, %v797_v43   ;;  %2246 = vmatprep.mubr.msk.f32.mxu1 %vm702_vm1, %v1753_v4 }
 0x405   :  { %1827 = vmatmul.mubr.f32.vlgmr.msra.gmra.mrb[8].mxu1 %v1695_v38 }
 0x408   :  { %1888 = vperm.xlu1 %2563, %v799_v17  }
 0x463   :  { %v4048_v51 = vpop.permute.xlu1 %1295 }
 0x467   :  { %v803_v55 = vpop.permute.xlu1 %802 }
 0x468   :  { %v937_v12 = vadd.f32 %v3917_v35, %v803_v55  ;;  %v939_v31 = vadd.f32 %v3919_v36, %v803_v55  ;;  %v2700_v55 = vld [vmem:[%s4247_s0 + $0x10] sm:$0xff] }
 0x46a   :  { %v2196_v61 = vmul.f32 -1.442695, %v937_v12  ;;  %v2197_v6 = vmul.f32 -1.442695, %v939_v31 }
 0x46b   :  { %v808_v44 = vpop.permute.xlu1 %807 }
 0x46c   :  { %2588 = vpow2.f32 %v2196_v61  ;;  %v943_v57 = vadd.f32 %v3923_v2, %v808_v44  ;;  %v945_v40 = vadd.f32 %v3925_v5, %v808_v44  ;;  %v2701_v61 = vld [vmem:[%s4247_s0 + $0x18] sm:$0xff] }
 0x46d   :  { %2590 = vpow2.f32 %v2197_v6 }
 0x46e   :  { %v2198_v43 = vmul.f32 -1.442695, %v943_v57  ;;  %v2199_v7 = vmul.f32 -1.442695, %v945_v40 }
 0x46f   :  { %v818_v42 = vpop.permute.xlu1 %817 }
 0x470   :  { %2592 = vpow2.f32 %v2198_v43  ;;  %v955_v63 = vadd.f32 %v3927_v59, %v818_v42  ;;  %v957_v41 = vadd.f32 %v3929_v60, %v818_v42  ;;  %v2702_v43 = vld [vmem:[%s4247_s0 + $0x30] sm:$0xff]  ;;  %v2703_v42 = vld [vmem:[%s4247_s0 + $0x38] sm:$0xff] }
 0x471   :  { %2594 = vpow2.f32 %v2199_v7 }
 0x472   :  { %v2202_v35 = vmul.f32 -1.442695, %v955_v63  ;;  %v2203_v36 = vmul.f32 -1.442695, %v957_v41 }
 0x473   :  { %v828_v47 = vpop.permute.xlu1 %827 }
 0x474   :  { %2596 = vpow2.f32 %v2202_v35  ;;  %v967_v48 = vadd.f32 %v3931_v19, %v828_v47  ;;  %v969_v2 = vadd.f32 %v3933_v21, %v828_v47  ;;  %v2704_v35 = vld [vmem:[%s4247_s0 + $0x50] sm:$0xff] }
 0x475   :  { %2598 = vpow2.f32 %v2203_v36 }
 0x476   :  { %v2589_v5 = vpop.eup %2588  ;;  %v2206_v52 = vmul.f32 -1.442695, %v967_v48  ;;  %v2207_v1 = vmul.f32 -1.442695, %v969_v2  ;;  %v2705_v2 = vld [vmem:[%s4247_s0 + $0x58] sm:$0xff] }
 0x477   :  { %v2591_v53 = vpop.eup %2590  ;;  %v1031_v54 = vadd.f32 1.0, %v2589_v5  ;;  %v838_v11 = vpop.permute.xlu1 %837 }
 0x478   :  { %v1032_v14 = vadd.f32 1.0, %v2591_v53  ;;  %2600 = vpow2.f32 %v2206_v52  ;;  %v979_v59 = vadd.f32 %v3938_v45, %v838_v11  ;;  %v981_v60 = vadd.f32 %v3940_v50, %v838_v11  ;;  %v2706_v52 = vld [vmem:[%s4247_s0 + $0x70] sm:$0xff] }
 0x479   :  { %2602 = vrcp.f32 %v1031_v54 }
 0x47a   :  { %v2593_v15 = vpop.eup %2592  ;;  %2604 = vrcp.f32 %v1032_v14  ;;  %v2210_v16 = vmul.f32 -1.442695, %v979_v59  ;;  %v2211_v21 = vmul.f32 -1.442695, %v981_v60  ;;  %v1298_v59 = vmul.f32 %v4048_v51, %v3488_v56  ;;  %v1854_v56 = vpop.permute.xlu0 %1853 }
 0x47b   :  { %v2595_v19 = vpop.eup %2594  ;;  %v1033_v17 = vadd.f32 1.0, %v2593_v15  ;;  %2606 = vpow2.f32 %v2207_v1  ;;  %v2707_v1 = vld [vmem:[%s4247_s0 + $0x78] sm:$0xff] }
 0x47c   :  { %v1034_v18 = vadd.f32 1.0, %v2595_v19  ;;  %2608 = vpow2.f32 %v2210_v16  ;;  %v1299_v16 = vmul.f32 %v4048_v51, %v3490_v58 }
 0x47d   :  { %2610 = vrcp.f32 %v1033_v17 }
 0x47e   :  { %v2597_v28 = vpop.eup %2596  ;;  %2612 = vrcp.f32 %v1034_v18 }
 0x47f   :  { %v2599_v22 = vpop.eup %2598  ;;  %v1037_v8 = vadd.f32 1.0, %v2597_v28  ;;  %2614 = vpow2.f32 %v2211_v21 }
 0x480   :  { %v1038_v10 = vadd.f32 1.0, %v2599_v22  ;;  %v1864_v22 = vpop.permute.xlu0 %1863 }
 0x481   :  { %2616 = vrcp.f32 %v1037_v8 }
 0x482   :  { %v2601_v45 = vpop.eup %2600  ;;  %2618 = vrcp.f32 %v1038_v10 }
 0x483   :  { %v2603_v50 = vpop.eup %2602  ;;  %v1041_v37 = vadd.f32 1.0, %v2601_v45 }
 0x484   :  { %v2605_v46 = vpop.eup %2604  ;;  %v1079_v9 = vmul.f32 %v2698_v33, %v2603_v50 }
 0x485   :  { %v2607_v26 = vpop.eup %2606  ;;  %v1080_v29 = vmul.f32 %v2699_v27, %v2605_v46  ;;  %2620 = vrcp.f32 %v1041_v37 }
 0x486   :  { %v2609_v30 = vpop.eup %2608  ;;  %1095 = vst [vmem:[%s4260_s13] sm:$0xff] %v1079_v9  ;;  %v1042_v23 = vadd.f32 1.0, %v2607_v26 }
 0x487   :  { %v2611_v34 = vpop.eup %2610  ;;  %1096 = vst [vmem:[%s4260_s13 + $0x8] sm:$0xff] %v1080_v29  ;;  %v1045_v38 = vadd.f32 1.0, %v2609_v30 }
 0x488   :  { %v2613_v4 = vpop.eup %2612  ;;  %v1081_v12 = vmul.f32 %v2700_v55, %v2611_v34  ;;  %2622 = vrcp.f32 %v1042_v23  ;;  %v1874_v34 = vpop.permute.xlu0 %1873 }
 0x489   :  { %v2615_v31 = vpop.eup %2614  ;;  %v1082_v6 = vmul.f32 %v2701_v61, %v2613_v4  ;;  %2624 = vrcp.f32 %v1045_v38 }
 0x48a   :  { %1097 = vst [vmem:[%s4260_s13 + $0x10] sm:$0xff] %v1081_v12  ;;  %v1046_v44 = vadd.f32 1.0, %v2615_v31 }
 0x48b   :  { %v2617_v57 = vpop.eup %2616  ;;  %1098 = vst [vmem:[%s4260_s13 + $0x18] sm:$0xff] %v1082_v6 }
 0x48c   :  { %v2619_v40 = vpop.eup %2618  ;;  %v1085_v7 = vmul.f32 %v2702_v43, %v2617_v57  ;;  %2626 = vrcp.f32 %v1046_v44 }
 0x48d   :  { %v1086_v63 = vmul.f32 %v2703_v42, %v2619_v40 }
 0x48e   :  { %1101 = vst [vmem:[%s4260_s13 + $0x30] sm:$0xff] %v1085_v7 }
 0x48f   :  { %v2621_v41 = vpop.eup %2620  ;;  %1102 = vst [vmem:[%s4260_s13 + $0x38] sm:$0xff] %v1086_v63 }
 0x490   :  { %v1089_v36 = vmul.f32 %v2704_v35, %v2621_v41 }
 0x492   :  { %v2623_v47 = vpop.eup %2622  ;;  %1105 = vst [vmem:[%s4260_s13 + $0x50] sm:$0xff] %v1089_v36 }
 0x493   :  { %v2625_v48 = vpop.eup %2624  ;;  %v1090_v5 = vmul.f32 %v2705_v2, %v2623_v47 }
 0x494   :  { %v1093_v53 = vmul.f32 %v2706_v52, %v2625_v48  ;;  %v1884_v52 = vpop.permute.xlu0 %1883 }
 0x495   :  { %1106 = vst [vmem:[%s4260_s13 + $0x58] sm:$0xff] %v1090_v5 }
 0x496   :  { %v2627_v54 = vpop.eup %2626  ;;  %1109 = vst [vmem:[%s4260_s13 + $0x70] sm:$0xff] %v1093_v53 }
 0x497   :  { %v1094_v11 = vmul.f32 %v2707_v1, %v2627_v54 }
 0x499   :  { %1110 = vst [vmem:[%s4260_s13 + $0x78] sm:$0xff] %v1094_v11 }
 0x4d8   :  { %v1828_v14 = vpop.f32.mrb[8].mxu1 }
 0x4d9   :  { %v1829_v60 = vadd.f32 %v1828_v14, %v3921_v0  ;;  %v1830_v15 = vpop.f32.mrb[9].mxu1 }
 0x4da   :  { %v1831_v19 = vadd.f32 %v1830_v15, %v3921_v0 }
 0x4db   :  { %v1841_v17 = vadd.f32 %v1829_v60, %v1298_v59 }
 0x4dc   :  { %v1842_v21 = vadd.f32 %v1831_v19, %v1299_v16 }
 0x4de   :  { %2247 = vmatprep.subr.msk.mxu0 %vm142_vm5, %v1842_v21 }
 0x4df   :  { %2248 = vmatpush1.msk.msra.mxu0 %vm142_vm5, %v1841_v17 }
 0x4e0   :  { %2249 = vmatmul.mubr.msk.f32.vlgmr.msra.gmra.mrb[22].mxu0 %vm151_vm15, %v3579_v24 }
 0x4e1   :  { %1991 = vmatprep.mubr.f32.mxu0 %v2724_v3 }
 0x4e4   :  { %2250 = vmatmul.mubr.msk.f32.gmra.mrb[24].mxu0 %vm151_vm15, %v3601_v32 }
 0x4e5   :  { %1997 = vmatprep.mubr.f32.mxu0 %v2724_v3 }
 0x4e8   :  { %2251 = vmatmul.mubr.msk.f32.gmra.mrb[26].mxu0 %vm151_vm15, %v3621_v49 }
 0x4e9   :  { %2003 = vmatprep.mubr.f32.mxu0 %v2724_v3 }
 0x4ec   :  { %2252 = vmatmul.mubr.msk.f32.gmra.mrb[28].mxu0 %vm151_vm15, %v3641_v62 }
 0x4ed   :  { %2009 = vmatprep.mubr.f32.mxu0 %v2724_v3 }
 0x4f0   :  { %2253 = vmatmul.mubr.msk.f32.gmra.mrb[30].mxu0 %vm151_vm15, %v3661_v13  ;;  %v1859_v13 = vpop.permute.xlu1 %1858 }
 0x4f1   :  { %2015 = vmatprep.mubr.f32.mxu0 %v2724_v3 }
 0x4f4   :  { %2254 = vmatmul.mubr.msk.f32.gmra.mrb[32].mxu0 %vm151_vm15, %v3681_v20  ;;  %v1869_v37 = vpop.permute.xlu1 %1868 }
 0x4f5   :  { %2021 = vmatprep.mubr.f32.mxu0 %v2724_v3 }
 0x4f8   :  { %2255 = vmatmul.mubr.msk.f32.gmra.mrb[34].mxu0 %vm151_vm15, %v3701_v25  ;;  %v1879_v43 = vpop.permute.xlu1 %1878 }
 0x4f9   :  { %2027 = vmatprep.mubr.f32.mxu0 %v2724_v3 }
 0x4fc   :  { %2256 = vmatmul.mubr.msk.f32.gmra.mrb[36].mxu0 %vm151_vm15, %v3721_v39  ;;  %v1889_v17 = vpop.permute.xlu1 %1888 }
 0x5b3   :  { %v1987_v58 = vpop.f32.mrb[22].mxu0 }
 0x5b4   :  { %v1988_v24 = vadd.f32 %v1987_v58, %v1854_v56  ;;  %v1989_v32 = vpop.f32.mrb[23].mxu0 }
 0x5b5   :  { %v1990_v49 = vadd.f32 %v1989_v32, %v1854_v56  ;;  %v2708_v32 = vld [vmem:[%s4247_s0 + $0x80] sm:$0xff] }
 0x5b6   :  { %v2257_v62 = vmul.f32 -1.442695, %v1988_v24 }
 0x5b7   :  { %v2258_v0 = vmul.f32 -1.442695, %v1990_v49  ;;  %v1993_v51 = vpop.f32.mrb[24].mxu0 }
 0x5b8   :  { %2628 = vpow2.f32 %v2257_v62  ;;  %v1994_v20 = vadd.f32 %v1993_v51, %v1859_v13  ;;  %v1995_v18 = vpop.f32.mrb[25].mxu0  ;;  %v2709_v51 = vld [vmem:[%s4247_s0 + $0x88] sm:$0xff] }
 0x5b9   :  { %2630 = vpow2.f32 %v2258_v0  ;;  %v1996_v28 = vadd.f32 %v1995_v18, %v1859_v13 }
 0x5ba   :  { %v2259_v25 = vmul.f32 -1.442695, %v1994_v20 }
 0x5bb   :  { %v2260_v3 = vmul.f32 -1.442695, %v1996_v28  ;;  %v1999_v8 = vpop.f32.mrb[26].mxu0 }
 0x5bc   :  { %2632 = vpow2.f32 %v2259_v25  ;;  %v2000_v39 = vadd.f32 %v1999_v8, %v1864_v22  ;;  %v2001_v10 = vpop.f32.mrb[27].mxu0 }
 0x5bd   :  { %2634 = vpow2.f32 %v2260_v3  ;;  %v2002_v45 = vadd.f32 %v2001_v10, %v1864_v22 }
 0x5be   :  { %v2261_v50 = vmul.f32 -1.442695, %v2000_v39 }
 0x5bf   :  { %v2262_v46 = vmul.f32 -1.442695, %v2002_v45  ;;  %v2005_v33 = vpop.f32.mrb[28].mxu0  ;;  %v2710_v45 = vld [vmem:[%s4247_s0 + $0x90] sm:$0xff] }
 0x5c0   :  { %2636 = vpow2.f32 %v2261_v50  ;;  %v2006_v9 = vadd.f32 %v2005_v33, %v1869_v37  ;;  %v2007_v26 = vpop.f32.mrb[29].mxu0 }
 0x5c1   :  { %2638 = vpow2.f32 %v2262_v46  ;;  %v2008_v27 = vadd.f32 %v2007_v26, %v1869_v37  ;;  %v2711_v46 = vld [vmem:[%s4247_s0 + $0x98] sm:$0xff] }
 0x5c2   :  { %v2629_v29 = vpop.eup %2628  ;;  %v2263_v30 = vmul.f32 -1.442695, %v2006_v9 }
 0x5c3   :  { %v2631_v23 = vpop.eup %2630  ;;  %v2082_v38 = vadd.f32 1.0, %v2629_v29  ;;  %v2264_v4 = vmul.f32 -1.442695, %v2008_v27  ;;  %v2011_v55 = vpop.f32.mrb[30].mxu0 }
 0x5c4   :  { %v2083_v12 = vadd.f32 1.0, %v2631_v23  ;;  %2640 = vpow2.f32 %v2263_v30  ;;  %v2012_v31 = vadd.f32 %v2011_v55, %v1874_v34  ;;  %v2013_v61 = vpop.f32.mrb[31].mxu0  ;;  %v2712_v23 = vld [vmem:[%s4247_s0 + $0xa0] sm:$0xff] }
 0x5c5   :  { %2642 = vrcp.f32 %v2082_v38  ;;  %v2014_v6 = vadd.f32 %v2013_v61, %v1874_v34 }
 0x5c6   :  { %v2633_v44 = vpop.eup %2632  ;;  %2644 = vrcp.f32 %v2083_v12  ;;  %v2265_v57 = vmul.f32 -1.442695, %v2012_v31 }
 0x5c7   :  { %v2635_v40 = vpop.eup %2634  ;;  %v2084_v7 = vadd.f32 1.0, %v2633_v44  ;;  %2646 = vpow2.f32 %v2264_v4  ;;  %v2266_v42 = vmul.f32 -1.442695, %v2014_v6  ;;  %v2017_v63 = vpop.f32.mrb[32].mxu0  ;;  %v2713_v4 = vld [vmem:[%s4247_s0 + $0xa8] sm:$0xff] }
 0x5c8   :  { %v2085_v41 = vadd.f32 1.0, %v2635_v40  ;;  %2648 = vpow2.f32 %v2265_v57  ;;  %v2018_v35 = vadd.f32 %v2017_v63, %v1879_v43  ;;  %v2019_v36 = vpop.f32.mrb[33].mxu0  ;;  %v2714_v57 = vld [vmem:[%s4247_s0 + $0xb0] sm:$0xff]  ;;  %v2715_v63 = vld [vmem:[%s4247_s0 + $0xb8] sm:$0xff] }
 0x5c9   :  { %2650 = vrcp.f32 %v2084_v7  ;;  %v2020_v47 = vadd.f32 %v2019_v36, %v1879_v43  ;;  %v2716_v36 = vld [vmem:[%s4247_s0 + $0xc0] sm:$0xff] }
 0x5ca   :  { %v2637_v48 = vpop.eup %2636  ;;  %2652 = vrcp.f32 %v2085_v41  ;;  %v2267_v2 = vmul.f32 -1.442695, %v2018_v35 }
 0x5cb   :  { %v2639_v5 = vpop.eup %2638  ;;  %v2086_v53 = vadd.f32 1.0, %v2637_v48  ;;  %2654 = vpow2.f32 %v2266_v42  ;;  %v2268_v54 = vmul.f32 -1.442695, %v2020_v47  ;;  %v2023_v1 = vpop.f32.mrb[34].mxu0 }
 0x5cc   :  { %v2087_v11 = vadd.f32 1.0, %v2639_v5  ;;  %2656 = vpow2.f32 %v2267_v2  ;;  %v2024_v14 = vadd.f32 %v2023_v1, %v1884_v52  ;;  %v2025_v59 = vpop.f32.mrb[35].mxu0 }
 0x5cd   :  { %2658 = vrcp.f32 %v2086_v53  ;;  %v2026_v60 = vadd.f32 %v2025_v59, %v1884_v52 }
 0x5ce   :  { %v2641_v15 = vpop.eup %2640  ;;  %2660 = vrcp.f32 %v2087_v11  ;;  %v2269_v16 = vmul.f32 -1.442695, %v2024_v14  ;;  %v2718_v11 = vld [vmem:[%s4247_s0 + $0xd0] sm:$0xff] }
 0x5cf   :  { %v2643_v19 = vpop.eup %2642  ;;  %v2088_v21 = vadd.f32 1.0, %v2641_v15  ;;  %2662 = vpow2.f32 %v2268_v54  ;;  %v2270_v56 = vmul.f32 -1.442695, %v2026_v60  ;;  %v2029_v58 = vpop.f32.mrb[36].mxu0  ;;  %v2717_v54 = vld [vmem:[%s4247_s0 + $0xc8] sm:$0xff]  ;;  %v2719_v15 = vld [vmem:[%s4247_s0 + $0xd8] sm:$0xff] }
 0x5d0   :  { %v2645_v24 = vpop.eup %2644  ;;  %v2130_v49 = vmul.f32 %v2708_v32, %v2643_v19  ;;  %2664 = vpow2.f32 %v2269_v16  ;;  %v2030_v62 = vadd.f32 %v2029_v58, %v1889_v17  ;;  %v2031_v13 = vpop.f32.mrb[37].mxu0  ;;  %v2720_v19 = vld [vmem:[%s4247_s0 + $0xe0] sm:$0xff] }
 0x5d1   :  { %v2647_v0 = vpop.eup %2646  ;;  %v2131_v20 = vmul.f32 %v2709_v51, %v2645_v24  ;;  %2666 = vrcp.f32 %v2088_v21  ;;  %v2032_v18 = vadd.f32 %v2031_v13, %v1889_v17  ;;  %v2723_v13 = vld [vmem:[%s4247_s0 + $0xf8] sm:$0xff] }
 0x5d2   :  { %v2649_v28 = vpop.eup %2648  ;;  %2273 = vst [vmem:[%s4260_s13 + $0x80] sm:$0xff] %v2130_v49  ;;  %v2089_v25 = vadd.f32 1.0, %v2647_v0  ;;  %2668 = vpow2.f32 %v2270_v56  ;;  %v2271_v22 = vmul.f32 -1.442695, %v2030_v62  ;;  %v2721_v56 = vld [vmem:[%s4247_s0 + $0xe8] sm:$0xff]  ;;  %v2722_v49 = vld [vmem:[%s4247_s0 + $0xf0] sm:$0xff] }
 0x5d3   :  { %v2651_v3 = vpop.eup %2650  ;;  %2274 = vst [vmem:[%s4260_s13 + $0x88] sm:$0xff] %v2131_v20  ;;  %v2090_v8 = vadd.f32 1.0, %v2649_v28  ;;  %v2272_v39 = vmul.f32 -1.442695, %v2032_v18 }
 0x5d4   :  { %v2653_v10 = vpop.eup %2652  ;;  %v2132_v50 = vmul.f32 %v2710_v45, %v2651_v3  ;;  %2670 = vrcp.f32 %v2089_v25 }
 0x5d5   :  { %v2655_v37 = vpop.eup %2654  ;;  %v2133_v33 = vmul.f32 %v2711_v46, %v2653_v10  ;;  %2672 = vrcp.f32 %v2090_v8 }
 0x5d6   :  { %v2657_v9 = vpop.eup %2656  ;;  %2275 = vst [vmem:[%s4260_s13 + $0x90] sm:$0xff] %v2132_v50  ;;  %v2091_v26 = vadd.f32 1.0, %v2655_v37  ;;  %2674 = vpow2.f32 %v2271_v22 }
 0x5d7   :  { %v2659_v27 = vpop.eup %2658  ;;  %2276 = vst [vmem:[%s4260_s13 + $0x98] sm:$0xff] %v2133_v33  ;;  %v2092_v29 = vadd.f32 1.0, %v2657_v9  ;;  %2676 = vpow2.f32 %v2272_v39 }
 0x5d8   :  { %v2661_v30 = vpop.eup %2660  ;;  %v2134_v34 = vmul.f32 %v2712_v23, %v2659_v27  ;;  %2678 = vrcp.f32 %v2091_v26 }
 0x5d9   :  { %v2663_v38 = vpop.eup %2662  ;;  %v2135_v55 = vmul.f32 %v2713_v4, %v2661_v30  ;;  %2680 = vrcp.f32 %v2092_v29 }
 0x5da   :  { %v2665_v12 = vpop.eup %2664  ;;  %2277 = vst [vmem:[%s4260_s13 + $0xa0] sm:$0xff] %v2134_v34  ;;  %v2093_v31 = vadd.f32 1.0, %v2663_v38 }
 0x5db   :  { %v2667_v61 = vpop.eup %2666  ;;  %2278 = vst [vmem:[%s4260_s13 + $0xa8] sm:$0xff] %v2135_v55  ;;  %v2094_v6 = vadd.f32 1.0, %v2665_v12 }
 0x5dc   :  { %v2669_v44 = vpop.eup %2668  ;;  %v2136_v40 = vmul.f32 %v2714_v57, %v2667_v61  ;;  %2682 = vrcp.f32 %v2093_v31 }
 0x5dd   :  { %2684 = vrcp.f32 %v2094_v6  ;;  %v2095_v43 = vadd.f32 1.0, %v2669_v44 }
 0x5de   :  { %v2671_v7 = vpop.eup %2670  ;;  %2279 = vst [vmem:[%s4260_s13 + $0xb0] sm:$0xff] %v2136_v40 }
 0x5df   :  { %v2673_v42 = vpop.eup %2672  ;;  %v2137_v41 = vmul.f32 %v2715_v63, %v2671_v7  ;;  %2686 = vrcp.f32 %v2095_v43 }
 0x5e0   :  { %v2675_v35 = vpop.eup %2674  ;;  %v2138_v47 = vmul.f32 %v2716_v36, %v2673_v42 }
 0x5e1   :  { %v2677_v48 = vpop.eup %2676  ;;  %2280 = vst [vmem:[%s4260_s13 + $0xb8] sm:$0xff] %v2137_v41  ;;  %v2096_v2 = vadd.f32 1.0, %v2675_v35 }
 0x5e2   :  { %v2679_v5 = vpop.eup %2678  ;;  %2281 = vst [vmem:[%s4260_s13 + $0xc0] sm:$0xff] %v2138_v47  ;;  %v2097_v52 = vadd.f32 1.0, %v2677_v48 }
 0x5e3   :  { %v2681_v53 = vpop.eup %2680  ;;  %v2139_v1 = vmul.f32 %v2717_v54, %v2679_v5  ;;  %2688 = vrcp.f32 %v2096_v2 }
 0x5e4   :  { %v2140_v14 = vmul.f32 %v2718_v11, %v2681_v53  ;;  %2690 = vrcp.f32 %v2097_v52 }
 0x5e5   :  { %2282 = vst [vmem:[%s4260_s13 + $0xc8] sm:$0xff] %v2139_v1 }
 0x5e6   :  { %v2683_v59 = vpop.eup %2682  ;;  %2283 = vst [vmem:[%s4260_s13 + $0xd0] sm:$0xff] %v2140_v14 }
 0x5e7   :  { %v2685_v60 = vpop.eup %2684  ;;  %v2141_v16 = vmul.f32 %v2719_v15, %v2683_v59 }
 0x5e8   :  { %v2142_v17 = vmul.f32 %v2720_v19, %v2685_v60 }
 0x5e9   :  { %v2687_v21 = vpop.eup %2686  ;;  %2284 = vst [vmem:[%s4260_s13 + $0xd8] sm:$0xff] %v2141_v16 }
 0x5ea   :  { %2285 = vst [vmem:[%s4260_s13 + $0xe0] sm:$0xff] %v2142_v17  ;;  %v2143_v58 = vmul.f32 %v2721_v56, %v2687_v21 }
 0x5ec   :  { %2286 = vst [vmem:[%s4260_s13 + $0xe8] sm:$0xff] %v2143_v58 }
 0x5ed   :  { %v2689_v24 = vpop.eup %2688 }
 0x5ee   :  { %v2691_v32 = vpop.eup %2690  ;;  %v2144_v62 = vmul.f32 %v2722_v49, %v2689_v24 }
 0x5ef   :  { %v2145_v0 = vmul.f32 %v2723_v13, %v2691_v32 }
 0x5f0   :  { %2287 = vst [vmem:[%s4260_s13 + $0xf0] sm:$0xff] %v2144_v62 }
 0x5f1   :  { %2288 = vst [vmem:[%s4260_s13 + $0xf8] sm:$0xff] %v2145_v0 }

</bundles_post_ra>
